<compile_context>
chip_gen: v6e
topology: v6e:2x2x1
jax: 0.10.0
libtpu: 0.0.40
codegen_flags: <defaults>
</compile_context>

<pallas_src>
import functools

import jax
import jax.numpy as jnp
from jax.experimental import pallas as pl
from jax.experimental.pallas import tpu as pltpu


# ----------------------------------------------------------------------------
# Pallas kernels
# ----------------------------------------------------------------------------
def _conv_bn_kernel(*refs, kh, kw, pad, out_w, th, fuse_input_act):
    """One (image, output-row-tile) step of a stride-1 direct conv + BN stats.

    refs (in order):
      x_ref    : (1, Hin, Win, Cin)      un-padded image (same block across row
                                         tiles -> DMA'd once per image)
      w_ref    : (kh*kw, Cin, Cout)      per-tap weight matrices (resident)
      ab_ref   : (2, Cin)                [fuse_input_act] previous BN scale /
                                         shift; relu(x*a+b) fused on input load
      o_ref    : (1, 1, th*out_w, Cout)  raw conv output tile (pre-BN)
      sum_ref  : (1, 1, 1, Cout)         per-tile sum of the conv output
      ssq_ref  : (1, 1, 1, Cout)         per-tile sum of squares
      xpad_ref : VMEM (Hin+2p, Win+2p, Cin)  [pad > 0] padded-image scratch
    """
    refs = list(refs)
    x_ref = refs.pop(0)
    w_ref = refs.pop(0)
    ab_ref = refs.pop(0) if fuse_input_act else None
    o_ref, sum_ref, ssq_ref = refs[0], refs[1], refs[2]
    xpad_ref = refs[3] if pad > 0 else None

    h_in, w_in, c_in = x_ref.shape[1], x_ref.shape[2], x_ref.shape[3]
    c_out = w_ref.shape[-1]
    tile_m = th * out_w
    r = pl.program_id(1)

    def act(v):
        if fuse_input_act:
            return jnp.maximum(v * ab_ref[0:1, :] + ab_ref[1:2, :], 0.0)
        return v

    if pad > 0:
        hp, wp = h_in + 2 * pad, w_in + 2 * pad

        @pl.when(r == 0)
        def _fill():
            # Fresh image: write the activated interior; zero only the 1-px
            # border instead of re-zeroing the whole padded buffer each step.
            zrow = jnp.zeros((pad, wp, c_in), jnp.float32)
            xpad_ref[0:pad, :, :] = zrow
            xpad_ref[hp - pad:hp, :, :] = zrow
            zcol = jnp.zeros((h_in, pad, c_in), jnp.float32)
            xpad_ref[pad:pad + h_in, 0:pad, :] = zcol
            xpad_ref[pad:pad + h_in, wp - pad:wp, :] = zcol
            xpad_ref[pad:pad + h_in, pad:pad + w_in, :] = act(x_ref[0])

    row0 = pl.multiple_of(r * th, th)

    def tap(i, j):
        if pad > 0:
            v = xpad_ref[pl.ds(row0 + i, th), j:j + out_w, :]
        else:
            v = act(x_ref[0, pl.ds(row0 + i, th), j:j + out_w, :])
        return v.reshape(tile_m, c_in)

    if kh * kw > 1 and c_in % 128 == 0:
        # Lane-aligned Cin: merge all taps into one K = kh*kw*Cin matmul
        # (fills the 256-deep MXU on v6e/v7x, single result drain).
        a = jnp.concatenate([tap(t // kw, t % kw) for t in range(kh * kw)],
                            axis=-1)
        acc = jnp.dot(a, w_ref[...].reshape(kh * kw * c_in, c_out),
                      preferred_element_type=jnp.float32)
    else:
        # Small / unaligned Cin: per-tap dots into the vreg-resident tile acc.
        acc = jnp.zeros((tile_m, c_out), jnp.float32)
        for t in range(kh * kw):
            acc = acc + jnp.dot(tap(t // kw, t % kw), w_ref[t],
                                preferred_element_type=jnp.float32)

    o_ref[0, 0] = acc
    # BN batch-statistics partial sums straight off the tile accumulator.
    sum_ref[0, 0] = jnp.sum(acc, axis=0, keepdims=True)
    ssq_ref[0, 0] = jnp.sum(acc * acc, axis=0, keepdims=True)


def _bn_add_relu_kernel(a_ref, r_ref, v_ref, o_ref):
    # relu( (a*v0 + v1) + (r*v2 + v3) ): fused bn2 + bn_shortcut + add + relu.
    main = a_ref[...] * v_ref[0:1, :] + v_ref[1:2, :]
    res = r_ref[...] * v_ref[2:3, :] + v_ref[3:4, :]
    o_ref[...] = jnp.maximum(main + res, 0.0)


# ----------------------------------------------------------------------------
# Plain-JAX glue: quantization, conv lowering (space-to-depth), BN finalize
# ----------------------------------------------------------------------------
def quantize_weight(w, n_bits=7):
    # step = max|W| / (2^7 - 1); QW = round(W/step); effective weight = QW*step.
    step = jnp.max(jnp.abs(w)) / (2 ** n_bits - 1)
    step = jnp.where(step == 0, jnp.ones_like(step), step)   # all-zero guard
    return jnp.round(w / step) * step


def _lower_conv(x_nhwc, w_oihw, stride, pad):
    """Rewrite a (possibly strided) conv as an equivalent stride-1 direct conv.

    Returns (x_prep, w_taps, kernel_pad, kh_d, kw_d, out_h, out_w):
      x_prep : (N, Hd, Wd, Cd) NHWC input of the stride-1 conv
      w_taps : (kh_d*kw_d, Cd, Cout)
    Stride>1 3x3 convs use space-to-depth (one 1x data reorganization — no 9x
    im2col); strided 1x1 convs just subsample.  Padding of stride-1 convs is
    left to the kernel (done in VMEM); strided convs fold padding into the
    same reorganization pass.
    """
    n, h, w, cin = x_nhwc.shape
    cout, cin_w, kh, kw = w_oihw.shape
    assert cin == cin_w
    out_h = (h + 2 * pad - kh) // stride + 1
    out_w = (w + 2 * pad - kw) // stride + 1
    w_hwio = jnp.transpose(w_oihw, (2, 3, 1, 0))            # (kh, kw, Cin, Cout)

    if stride == 1:
        return (x_nhwc, w_hwio.reshape(kh * kw, cin, cout),
                pad, kh, kw, out_h, out_w)

    s = stride
    xp = x_nhwc
    if pad > 0:
        xp = jnp.pad(xp, ((0, 0), (pad, pad), (pad, pad), (0, 0)))

    if kh == 1 and kw == 1:
        x_prep = xp[:, ::s, ::s, :][:, :out_h, :out_w, :]
        return x_prep, w_hwio.reshape(1, cin, cout), 0, 1, 1, out_h, out_w

    hp, wp = h + 2 * pad, w + 2 * pad
    kh_d, kw_d = -(-kh // s), -(-kw // s)
    hd, wd = -(-hp // s), -(-wp // s)
    xp = jnp.pad(xp, ((0, 0), (0, hd * s - hp), (0, wd * s - wp), (0, 0)))
    x_prep = (xp.reshape(n, hd, s, wd, s, cin)
              .transpose(0, 1, 3, 2, 4, 5)
              .reshape(n, hd, wd, s * s * cin))
    wd_full = jnp.zeros((kh_d, kw_d, s, s, cin, cout), w_hwio.dtype)
    for i in range(kh):
        for j in range(kw):
            wd_full = wd_full.at[i // s, j // s, i % s, j % s].set(w_hwio[i, j])
    w_taps = wd_full.reshape(kh_d * kw_d, s * s * cin, cout)
    return x_prep, w_taps, 0, kh_d, kw_d, out_h, out_w


def _pick_row_tile(out_h, out_w, target=512):
    """Output rows per tile: largest divisor of out_h with <= `target` output
    pixels per tile, preferring >= 2 tiles so the pipeline has steps to hide
    DMA and the accumulator stays vreg-sized."""
    fit = [d for d in range(1, out_h + 1)
           if out_h % d == 0 and d * out_w <= target]
    if not fit:
        return 1
    th = max(fit)
    if th == out_h and out_h > 1:
        proper = [d for d in fit if d < out_h]
        if proper:
            th = max(proper)
    return th


def _conv_bn_lowered(x_prep, w_taps, kpad, kh, kw, out_h, out_w,
                     gamma, beta, in_affine=None, eps=1e-5):
    """Run the conv+BN-stats pallas_call on already-lowered (stride-1) inputs."""
    n, hd, wd, cd = x_prep.shape
    cout = w_taps.shape[-1]
    th = _pick_row_tile(out_h, out_w)
    ntiles = out_h // th
    tile_m = th * out_w

    kernel = functools.partial(
        _conv_bn_kernel, kh=kh, kw=kw, pad=kpad, out_w=out_w, th=th,
        fuse_input_act=in_affine is not None)

    in_specs = [
        pl.BlockSpec((1, hd, wd, cd), lambda b, r: (b, 0, 0, 0)),
        pl.BlockSpec((kh * kw, cd, cout), lambda b, r: (0, 0, 0)),
    ]
    args = [x_prep.astype(jnp.float32), w_taps.astype(jnp.float32)]
    if in_affine is not None:
        ab = jnp.stack([in_affine[0], in_affine[1]]).astype(jnp.float32)
        in_specs.append(pl.BlockSpec((2, cd), lambda b, r: (0, 0)))
        args.append(ab)

    scratch = []
    if kpad > 0:
        scratch.append(
            pltpu.VMEM((hd + 2 * kpad, wd + 2 * kpad, cd), jnp.float32))

    flops = 2 * n * out_h * out_w * kh * kw * cd * cout
    bytes_accessed = 4 * (x_prep.size + w_taps.size
                          + n * out_h * out_w * cout + 2 * n * ntiles * cout)

    conv_out, psum, pssq = pl.pallas_call(
        kernel,
        out_shape=[
            jax.ShapeDtypeStruct((n, ntiles, tile_m, cout), jnp.float32),
            jax.ShapeDtypeStruct((n, ntiles, 1, cout), jnp.float32),
            jax.ShapeDtypeStruct((n, ntiles, 1, cout), jnp.float32),
        ],
        grid=(n, ntiles),
        in_specs=in_specs,
        out_specs=[
            pl.BlockSpec((1, 1, tile_m, cout), lambda b, r: (b, r, 0, 0)),
            pl.BlockSpec((1, 1, 1, cout), lambda b, r: (b, r, 0, 0)),
            pl.BlockSpec((1, 1, 1, cout), lambda b, r: (b, r, 0, 0)),
        ],
        scratch_shapes=scratch,
        compiler_params=pltpu.CompilerParams(
            dimension_semantics=("parallel", "arbitrary")),
        cost_estimate=pl.CostEstimate(
            flops=flops, transcendentals=0, bytes_accessed=bytes_accessed),
    )(*args)

    # Finalize training-mode BatchNorm statistics (tiny per-channel math).
    count = n * out_h * out_w
    mean = jnp.sum(psum, axis=(0, 1, 2)) / count
    # TODO(synk): E[x^2]-E[x]^2 is cancellation-prone for large activations;
    # use a shifted / Welford formulation for production training.
    var = jnp.maximum(jnp.sum(pssq, axis=(0, 1, 2)) / count - mean * mean, 0.0)
    scale = gamma / jnp.sqrt(var + eps)
    shift = beta - mean * scale
    return conv_out.reshape(n, out_h, out_w, cout), scale, shift


def conv_bn_pallas(x_nhwc, w_oihw, stride, pad, gamma, beta,
                   in_affine=None, eps=1e-5):
    """Quantized conv2d (no bias) + training-mode BN statistics.

    Returns (conv_out NHWC *pre-BN*, bn_scale (Cout,), bn_shift (Cout,)) so the
    affine can be fused into a downstream kernel.  If `in_affine=(scale,
    shift)` is given, relu(x*scale+shift) is applied to the input inside the
    kernel (fuses the previous BN+ReLU; stride-1 convs only).
    """
    if in_affine is not None and stride != 1:
        raise NotImplementedError("input-activation fusion needs stride == 1")
    wq = quantize_weight(w_oihw).astype(jnp.float32)
    x_prep, w_taps, kpad, kh_d, kw_d, out_h, out_w = _lower_conv(
        x_nhwc.astype(jnp.float32), wq, stride, pad)
    return _conv_bn_lowered(x_prep, w_taps, kpad, kh_d, kw_d, out_h, out_w,
                            gamma, beta, in_affine=in_affine, eps=eps)


# ----------------------------------------------------------------------------
# Fused bn2 + bn_shortcut + add + relu
# ----------------------------------------------------------------------------
def _row_tile(m, target=1024):
    # Largest tile <= target that divides m and is sublane-aligned (or == m).
    for t in range(min(target, m), 0, -1):
        if m % t == 0 and (t % 8 == 0 or t == m):
            return t
    return m


def bn_add_relu_pallas(a, r, sa, ba, sr, br):
    """relu((a*sa+ba) + (r*sr+br)); a, r: (M, C); vectors: (C,)."""
    m, c = a.shape
    # Lane-dense view: group rows so the store lane width is ~512 (full-width
    # vst even for C<128; wider lanes amortize per-grid-step overhead too).
    g = max(1, 512 // c)
    while g > 1 and m % g:
        g -= 1
    if g > 1:
        a = a.reshape(m // g, g * c)
        r = r.reshape(m // g, g * c)
        sa, ba, sr, br = (jnp.tile(v, g) for v in (sa, ba, sr, br))
    mg, cg = a.shape
    vecs = jnp.stack([sa, ba, sr, br]).astype(jnp.float32)       # (4, cg)
    tm = _row_tile(mg)
    out = pl.pallas_call(
        _bn_add_relu_kernel,
        out_shape=jax.ShapeDtypeStruct((mg, cg), jnp.float32),
        grid=(mg // tm,),
        in_specs=[
            pl.BlockSpec((tm, cg), lambda i: (i, 0)),
            pl.BlockSpec((tm, cg), lambda i: (i, 0)),
            pl.BlockSpec((4, cg), lambda i: (0, 0)),
        ],
        out_specs=pl.BlockSpec((tm, cg), lambda i: (i, 0)),
        compiler_params=pltpu.CompilerParams(
            dimension_semantics=("parallel",)),
    )(a.astype(jnp.float32), r.astype(jnp.float32), vecs)
    return out.reshape(m, c)


# ----------------------------------------------------------------------------
# BasicBlock forward
# ----------------------------------------------------------------------------
def basic_block_forward(x_nchw, params, stride):
    x = jnp.transpose(x_nchw, (0, 2, 3, 1)).astype(jnp.float32)   # NHWC
    cin = x.shape[-1]
    planes = params["w1"].shape[0]

    # conv1 (quantized 3x3, `stride`, pad 1) + fused bn1 batch statistics.
    wq1 = quantize_weight(params["w1"]).astype(jnp.float32)
    x1_prep, w1_taps, kpad1, kh1, kw1, oh, ow = _lower_conv(x, wq1, stride, 1)
    c1, s1, t1 = _conv_bn_lowered(x1_prep, w1_taps, kpad1, kh1, kw1, oh, ow,
                                  params["g1"], params["b1"])
    nb = c1.shape[0]

    # conv2 (quantized 3x3, stride 1, pad 1): relu(bn1(.)) fused into its input
    # load path; bn2 batch statistics fused in-kernel.
    c2, s2, t2 = conv_bn_pallas(c1, params["w2"], 1, 1,
                                params["g2"], params["b2"],
                                in_affine=(s1, t1))

    # shortcut
    if stride != 1 or cin != planes:
        ws = params["ws"]
        wqs = quantize_weight(ws).astype(jnp.float32)
        # Reuse conv1's space-to-depth input for the 1x1 stride-s shortcut when
        # possible (read x from HBM once, not three times): embed the 1x1
        # weight at sub-position (p1, p1) of the s*s*Cin channel axis.
        p1 = 1                                            # conv1 padding
        reuse = (stride > 1 and kpad1 == 0 and p1 < stride
                 and ws.shape[2] == 1 and ws.shape[3] == 1
                 and x1_prep.shape[-1] == stride * stride * cin)
        if reuse:
            w_mat = wqs.reshape(planes, cin).T            # (Cin, planes)
            blk = p1 * stride + p1
            w_emb = jnp.zeros((stride * stride * cin, planes), jnp.float32)
            w_emb = w_emb.at[blk * cin:(blk + 1) * cin, :].set(w_mat)
            cs, ssc, tsc = _conv_bn_lowered(
                x1_prep, w_emb.reshape(1, stride * stride * cin, planes),
                0, 1, 1, oh, ow, params["gs"], params["bs"])
        else:
            cs, ssc, tsc = conv_bn_pallas(x, ws, stride, 0,
                                          params["gs"], params["bs"])
        res2d = cs.reshape(-1, planes)
    else:
        res2d = x.reshape(-1, planes)
        ssc = jnp.ones((planes,), jnp.float32)
        tsc = jnp.zeros((planes,), jnp.float32)

    # fused: relu( bn2(conv2) + bn_sc(shortcut) )
    out2d = bn_add_relu_pallas(c2.reshape(-1, planes), res2d, s2, t2, ssc, tsc)
    out = out2d.reshape(nb, oh, ow, planes)
    return jnp.transpose(out, (0, 3, 1, 2))                       # NCHW


# ----------------------------------------------------------------------------
# Pure-JAX reference (for verification)
# ----------------------------------------------------------------------------
def _ref_conv(x_nchw, w, stride, pad):
    return jax.lax.conv_general_dilated(
        x_nchw, w, window_strides=(stride, stride),
        padding=[(pad, pad), (pad, pad)],
        dimension_numbers=("NCHW", "OIHW", "NCHW"))


def _ref_bn_train(x_nchw, gamma, beta, eps=1e-5):
    mean = jnp.mean(x_nchw, axis=(0, 2, 3), keepdims=True)
    var = jnp.mean((x_nchw - mean) ** 2, axis=(0, 2, 3), keepdims=True)
    g = gamma.reshape(1, -1, 1, 1)
    b = beta.reshape(1, -1, 1, 1)
    return (x_nchw - mean) / jnp.sqrt(var + eps) * g + b


def basic_block_reference(x, params, stride):
    cin, planes = params["w1"].shape[1], params["w1"].shape[0]
    out = _ref_conv(x, quantize_weight(params["w1"]), stride, 1)
    out = jax.nn.relu(_ref_bn_train(out, params["g1"], params["b1"]))
    out = _ref_conv(out, quantize_weight(params["w2"]), 1, 1)
    out = _ref_bn_train(out, params["g2"], params["b2"])
    if stride != 1 or cin != planes:
        sc = _ref_conv(x, quantize_weight(params["ws"]), stride, 0)
        sc = _ref_bn_train(sc, params["gs"], params["bs"])
    else:
        sc = x
    return jax.nn.relu(out + sc)


# ----------------------------------------------------------------------------
# Main
# ----------------------------------------------------------------------------
if __name__ == "__main__":
    def make_params(key, in_planes, planes, with_shortcut):
        ks = jax.random.split(key, 9)

        def kaiming(rng, shape):
            fan_in = shape[1] * shape[2] * shape[3]
            return jax.random.normal(rng, shape, jnp.float32) * (2.0 / fan_in) ** 0.5

        p = {
            "w1": kaiming(ks[0], (planes, in_planes, 3, 3)),
            "g1": 1.0 + 0.1 * jax.random.normal(ks[1], (planes,), jnp.float32),
            "b1": 0.1 * jax.random.normal(ks[2], (planes,), jnp.float32),
            "w2": kaiming(ks[3], (planes, planes, 3, 3)),
            "g2": 1.0 + 0.1 * jax.random.normal(ks[4], (planes,), jnp.float32),
            "b2": 0.1 * jax.random.normal(ks[5], (planes,), jnp.float32),
        }
        if with_shortcut:
            p["ws"] = kaiming(ks[6], (planes, in_planes, 1, 1))
            p["gs"] = 1.0 + 0.1 * jax.random.normal(ks[7], (planes,), jnp.float32)
            p["bs"] = 0.1 * jax.random.normal(ks[8], (planes,), jnp.float32)
        return p

    key = jax.random.PRNGKey(0)
    k_a, k_b, k_xa, k_xb = jax.random.split(key, 4)

    # Config A: downsampling block (stride 2, channel change -> conv shortcut).
    batch, in_planes, planes, hw, stride = 2, 4, 8, 16, 2
    params_a = make_params(k_a, in_planes, planes, True)
    x_a = jax.random.normal(k_xa, (batch, in_planes, hw, hw), jnp.float32)

    fwd_a = jax.jit(functools.partial(basic_block_forward, stride=stride))
    y_a = fwd_a(x_a, params_a)
    jax.block_until_ready(y_a)
    y_a_ref = basic_block_reference(x_a, params_a, stride)
    assert y_a.shape == (batch, planes, hw // stride, hw // stride), y_a.shape
    err_a = float(jnp.max(jnp.abs(y_a - y_a_ref)))
    assert err_a < 1e-3, err_a

    # Config B: identity-shortcut block (stride 1, same channel count).
    params_b = make_params(k_b, planes, planes, False)
    x_b = jax.random.normal(k_xb, (batch, planes, 8, 8), jnp.float32)
    fwd_b = jax.jit(functools.partial(basic_block_forward, stride=1))
    y_b = fwd_b(x_b, params_b)
    jax.block_until_ready(y_b)
    y_b_ref = basic_block_reference(x_b, params_b, 1)
    assert y_b.shape == (batch, planes, 8, 8), y_b.shape
    err_b = float(jnp.max(jnp.abs(y_b - y_b_ref)))
    assert err_b < 1e-3, err_b

    print("KERNEL_OK")
</pallas_src>

<mosaic_0001>
module attributes {stable_mosaic.version = 11 : i64} {
  func.func @_conv_bn_kernel(%arg0: i32, %arg1: i32, %arg2: memref<1x8x8x8xf32, #tpu.memory_space<vmem>>, %arg3: memref<9x8x8xf32, #tpu.memory_space<vmem>>, %arg4: memref<2x8xf32, #tpu.memory_space<vmem>>, %arg5: memref<1x1x32x8xf32, #tpu.memory_space<vmem>>, %arg6: memref<1x1x1x8xf32, #tpu.memory_space<vmem>>, %arg7: memref<1x1x1x8xf32, #tpu.memory_space<vmem>>, %arg8: memref<10x10x8xf32, #tpu.memory_space<vmem>>) attributes {dimension_semantics = [#tpu.dimension_semantics<parallel>, #tpu.dimension_semantics<arbitrary>], iteration_bounds = array<i64: 2, 2>, scalar_prefetch = 0 : i64, scratch_operands = 1 : i64, tpu.core_type = #tpu.core_type<tc>, window_params = [{transform_indices = @transform_0, window_bounds = array<i64: 1, 8, 8, 8>}, {pipeline_mode = #tpu.pipeline_mode<synchronous>, transform_indices = @transform_1, window_bounds = array<i64: 9, 8, 8>}, {pipeline_mode = #tpu.pipeline_mode<synchronous>, transform_indices = @transform_2, window_bounds = array<i64: 2, 8>}, {transform_indices = @transform_3, window_bounds = array<i64: 1, 1, 32, 8>}, {transform_indices = @transform_4, window_bounds = array<i64: 1, 1, 1, 8>}, {transform_indices = @transform_5, window_bounds = array<i64: 1, 1, 1, 8>}]} {
    %c0_i32 = arith.constant 0 : i32
    %0 = arith.cmpi eq, %arg1, %c0_i32 : i32
    %1 = arith.extui %0 : i1 to i32
    %c0_i32_0 = arith.constant 0 : i32
    %2 = arith.cmpi ne, %1, %c0_i32_0 : i32
    scf.if %2 {
      %cst_67 = arith.constant 0.000000e+00 : f32
      %92 = vector.broadcast %cst_67 : f32 to vector<1x10x8xf32>
      %c0_68 = arith.constant 0 : index
      %c0_69 = arith.constant 0 : index
      %c0_70 = arith.constant 0 : index
      %93 = vector.load %arg8[%c0_68, %c0_69, %c0_70] : memref<10x10x8xf32, #tpu.memory_space<vmem>>, vector<1x10x8xf32>
      tpu.vector_store %arg8[%c0_68, %c0_69, %c0_70], %92 {strides = array<i32>} : memref<10x10x8xf32, #tpu.memory_space<vmem>>, vector<1x10x8xf32>,
      %c9 = arith.constant 9 : index
      %c0_71 = arith.constant 0 : index
      %c0_72 = arith.constant 0 : index
      %94 = vector.load %arg8[%c9, %c0_71, %c0_72] : memref<10x10x8xf32, #tpu.memory_space<vmem>>, vector<1x10x8xf32>
      tpu.vector_store %arg8[%c9, %c0_71, %c0_72], %92 {strides = array<i32>} : memref<10x10x8xf32, #tpu.memory_space<vmem>>, vector<1x10x8xf32>,
      %cst_73 = arith.constant 0.000000e+00 : f32
      %95 = vector.broadcast %cst_73 : f32 to vector<8x1x8xf32>
      %c1_74 = arith.constant 1 : index
      %c0_75 = arith.constant 0 : index
      %c0_76 = arith.constant 0 : index
      %96 = vector.load %arg8[%c1_74, %c0_75, %c0_76] : memref<10x10x8xf32, #tpu.memory_space<vmem>>, vector<8x1x8xf32>
      tpu.vector_store %arg8[%c1_74, %c0_75, %c0_76], %95 {strides = array<i32>} : memref<10x10x8xf32, #tpu.memory_space<vmem>>, vector<8x1x8xf32>,
      %c1_77 = arith.constant 1 : index
      %c9_78 = arith.constant 9 : index
      %c0_79 = arith.constant 0 : index
      %97 = vector.load %arg8[%c1_77, %c9_78, %c0_79] : memref<10x10x8xf32, #tpu.memory_space<vmem>>, vector<8x1x8xf32>
      tpu.vector_store %arg8[%c1_77, %c9_78, %c0_79], %95 {strides = array<i32>} : memref<10x10x8xf32, #tpu.memory_space<vmem>>, vector<8x1x8xf32>,
      %c0_80 = arith.constant 0 : index
      %c0_81 = arith.constant 0 : index
      %c0_82 = arith.constant 0 : index
      %c0_83 = arith.constant 0 : index
      %98 = vector.load %arg2[%c0_80, %c0_81, %c0_82, %c0_83] : memref<1x8x8x8xf32, #tpu.memory_space<vmem>>, vector<1x8x8x8xf32>
      %99 = vector.shape_cast %98 : vector<1x8x8x8xf32> to vector<8x8x8xf32>
      %c0_84 = arith.constant 0 : index
      %c0_85 = arith.constant 0 : index
      %100 = vector.load %arg4[%c0_84, %c0_85] : memref<2x8xf32, #tpu.memory_space<vmem>>, vector<1x8xf32>
      %101 = vector.shape_cast %100 : vector<1x8xf32> to vector<1x1x8xf32>
      %102 = vector.broadcast %101 : vector<1x1x8xf32> to vector<8x8x8xf32>
      %103 = arith.mulf %99, %102 : vector<8x8x8xf32>
      %c1_86 = arith.constant 1 : index
      %c0_87 = arith.constant 0 : index
      %104 = vector.load %arg4[%c1_86, %c0_87] : memref<2x8xf32, #tpu.memory_space<vmem>>, vector<1x8xf32>
      %105 = vector.shape_cast %104 : vector<1x8xf32> to vector<1x1x8xf32>
      %106 = vector.broadcast %105 : vector<1x1x8xf32> to vector<8x8x8xf32>
      %107 = arith.addf %103, %106 : vector<8x8x8xf32>
      %cst_88 = arith.constant 0.000000e+00 : f32
      %108 = vector.broadcast %cst_88 : f32 to vector<8x8x8xf32>
      %109 = arith.maximumf %107, %108 : vector<8x8x8xf32>
      %c1_89 = arith.constant 1 : index
      %c1_90 = arith.constant 1 : index
      %c0_91 = arith.constant 0 : index
      %110 = vector.load %arg8[%c1_89, %c1_90, %c0_91] : memref<10x10x8xf32, #tpu.memory_space<vmem>>, vector<8x8x8xf32>
      tpu.vector_store %arg8[%c1_89, %c1_90, %c0_91], %109 {strides = array<i32>} : memref<10x10x8xf32, #tpu.memory_space<vmem>>, vector<8x8x8xf32>,
    } else {
    }
    %c4_i32 = arith.constant 4 : i32
    %3 = arith.muli %arg1, %c4_i32 : i32
    %4 = tpu.assume_multiple %3, 4 : i32
    %cst = arith.constant 0.000000e+00 : f32
    %5 = vector.broadcast %cst : f32 to vector<32x8xf32>
    %c0_i32_1 = arith.constant 0 : i32
    %6 = arith.addi %4, %c0_i32_1 : i32
    %7 = arith.index_cast %6 : i32 to index
    %c0 = arith.constant 0 : index
    %c0_2 = arith.constant 0 : index
    %8 = vector.load %arg8[%7, %c0, %c0_2] : memref<10x10x8xf32, #tpu.memory_space<vmem>>, vector<4x8x8xf32>
    %9 = vector.shape_cast %8 : vector<4x8x8xf32> to vector<32x8xf32>
    %c0_3 = arith.constant 0 : index
    %c0_4 = arith.constant 0 : index
    %c0_5 = arith.constant 0 : index
    %10 = vector.load %arg3[%c0_3, %c0_4, %c0_5] : memref<9x8x8xf32, #tpu.memory_space<vmem>>, vector<1x8x8xf32>
    %11 = vector.shape_cast %10 : vector<1x8x8xf32> to vector<8x8xf32>
    %cst_6 = arith.constant dense<0.000000e+00> : vector<32x8xf32>
    %12 = tpu.matmul %9, %11, %cst_6 {dimension_numbers = #tpu.dot_dimension_numbers<[1], [0], [0], [1], [0, 0, 1, 1], [], []>} : vector<32x8xf32>, vector<8x8xf32>, vector<32x8xf32> -> vector<32x8xf32>
    %13 = arith.addf %5, %12 : vector<32x8xf32>
    %c0_i32_7 = arith.constant 0 : i32
    %14 = arith.addi %4, %c0_i32_7 : i32
    %15 = arith.index_cast %14 : i32 to index
    %c1 = arith.constant 1 : index
    %c0_8 = arith.constant 0 : index
    %16 = vector.load %arg8[%15, %c1, %c0_8] : memref<10x10x8xf32, #tpu.memory_space<vmem>>, vector<4x8x8xf32>
    %17 = vector.shape_cast %16 : vector<4x8x8xf32> to vector<32x8xf32>
    %c1_9 = arith.constant 1 : index
    %c0_10 = arith.constant 0 : index
    %c0_11 = arith.constant 0 : index
    %18 = vector.load %arg3[%c1_9, %c0_10, %c0_11] : memref<9x8x8xf32, #tpu.memory_space<vmem>>, vector<1x8x8xf32>
    %19 = vector.shape_cast %18 : vector<1x8x8xf32> to vector<8x8xf32>
    %cst_12 = arith.constant dense<0.000000e+00> : vector<32x8xf32>
    %20 = tpu.matmul %17, %19, %cst_12 {dimension_numbers = #tpu.dot_dimension_numbers<[1], [0], [0], [1], [0, 0, 1, 1], [], []>} : vector<32x8xf32>, vector<8x8xf32>, vector<32x8xf32> -> vector<32x8xf32>
    %21 = arith.addf %13, %20 : vector<32x8xf32>
    %c0_i32_13 = arith.constant 0 : i32
    %22 = arith.addi %4, %c0_i32_13 : i32
    %23 = arith.index_cast %22 : i32 to index
    %c2 = arith.constant 2 : index
    %c0_14 = arith.constant 0 : index
    %24 = vector.load %arg8[%23, %c2, %c0_14] : memref<10x10x8xf32, #tpu.memory_space<vmem>>, vector<4x8x8xf32>
    %25 = vector.shape_cast %24 : vector<4x8x8xf32> to vector<32x8xf32>
    %c2_15 = arith.constant 2 : index
    %c0_16 = arith.constant 0 : index
    %c0_17 = arith.constant 0 : index
    %26 = vector.load %arg3[%c2_15, %c0_16, %c0_17] : memref<9x8x8xf32, #tpu.memory_space<vmem>>, vector<1x8x8xf32>
    %27 = vector.shape_cast %26 : vector<1x8x8xf32> to vector<8x8xf32>
    %cst_18 = arith.constant dense<0.000000e+00> : vector<32x8xf32>
    %28 = tpu.matmul %25, %27, %cst_18 {dimension_numbers = #tpu.dot_dimension_numbers<[1], [0], [0], [1], [0, 0, 1, 1], [], []>} : vector<32x8xf32>, vector<8x8xf32>, vector<32x8xf32> -> vector<32x8xf32>
    %29 = arith.addf %21, %28 : vector<32x8xf32>
    %c1_i32 = arith.constant 1 : i32
    %30 = arith.addi %4, %c1_i32 : i32
    %31 = arith.index_cast %30 : i32 to index
    %c0_19 = arith.constant 0 : index
    %c0_20 = arith.constant 0 : index
    %32 = vector.load %arg8[%31, %c0_19, %c0_20] : memref<10x10x8xf32, #tpu.memory_space<vmem>>, vector<4x8x8xf32>
    %33 = vector.shape_cast %32 : vector<4x8x8xf32> to vector<32x8xf32>
    %c3 = arith.constant 3 : index
    %c0_21 = arith.constant 0 : index
    %c0_22 = arith.constant 0 : index
    %34 = vector.load %arg3[%c3, %c0_21, %c0_22] : memref<9x8x8xf32, #tpu.memory_space<vmem>>, vector<1x8x8xf32>
    %35 = vector.shape_cast %34 : vector<1x8x8xf32> to vector<8x8xf32>
    %cst_23 = arith.constant dense<0.000000e+00> : vector<32x8xf32>
    %36 = tpu.matmul %33, %35, %cst_23 {dimension_numbers = #tpu.dot_dimension_numbers<[1], [0], [0], [1], [0, 0, 1, 1], [], []>} : vector<32x8xf32>, vector<8x8xf32>, vector<32x8xf32> -> vector<32x8xf32>
    %37 = arith.addf %29, %36 : vector<32x8xf32>
    %c1_i32_24 = arith.constant 1 : i32
    %38 = arith.addi %4, %c1_i32_24 : i32
    %39 = arith.index_cast %38 : i32 to index
    %c1_25 = arith.constant 1 : index
    %c0_26 = arith.constant 0 : index
    %40 = vector.load %arg8[%39, %c1_25, %c0_26] : memref<10x10x8xf32, #tpu.memory_space<vmem>>, vector<4x8x8xf32>
    %41 = vector.shape_cast %40 : vector<4x8x8xf32> to vector<32x8xf32>
    %c4 = arith.constant 4 : index
    %c0_27 = arith.constant 0 : index
    %c0_28 = arith.constant 0 : index
    %42 = vector.load %arg3[%c4, %c0_27, %c0_28] : memref<9x8x8xf32, #tpu.memory_space<vmem>>, vector<1x8x8xf32>
    %43 = vector.shape_cast %42 : vector<1x8x8xf32> to vector<8x8xf32>
    %cst_29 = arith.constant dense<0.000000e+00> : vector<32x8xf32>
    %44 = tpu.matmul %41, %43, %cst_29 {dimension_numbers = #tpu.dot_dimension_numbers<[1], [0], [0], [1], [0, 0, 1, 1], [], []>} : vector<32x8xf32>, vector<8x8xf32>, vector<32x8xf32> -> vector<32x8xf32>
    %45 = arith.addf %37, %44 : vector<32x8xf32>
    %c1_i32_30 = arith.constant 1 : i32
    %46 = arith.addi %4, %c1_i32_30 : i32
    %47 = arith.index_cast %46 : i32 to index
    %c2_31 = arith.constant 2 : index
    %c0_32 = arith.constant 0 : index
    %48 = vector.load %arg8[%47, %c2_31, %c0_32] : memref<10x10x8xf32, #tpu.memory_space<vmem>>, vector<4x8x8xf32>
    %49 = vector.shape_cast %48 : vector<4x8x8xf32> to vector<32x8xf32>
    %c5 = arith.constant 5 : index
    %c0_33 = arith.constant 0 : index
    %c0_34 = arith.constant 0 : index
    %50 = vector.load %arg3[%c5, %c0_33, %c0_34] : memref<9x8x8xf32, #tpu.memory_space<vmem>>, vector<1x8x8xf32>
    %51 = vector.shape_cast %50 : vector<1x8x8xf32> to vector<8x8xf32>
    %cst_35 = arith.constant dense<0.000000e+00> : vector<32x8xf32>
    %52 = tpu.matmul %49, %51, %cst_35 {dimension_numbers = #tpu.dot_dimension_numbers<[1], [0], [0], [1], [0, 0, 1, 1], [], []>} : vector<32x8xf32>, vector<8x8xf32>, vector<32x8xf32> -> vector<32x8xf32>
    %53 = arith.addf %45, %52 : vector<32x8xf32>
    %c2_i32 = arith.constant 2 : i32
    %54 = arith.addi %4, %c2_i32 : i32
    %55 = arith.index_cast %54 : i32 to index
    %c0_36 = arith.constant 0 : index
    %c0_37 = arith.constant 0 : index
    %56 = vector.load %arg8[%55, %c0_36, %c0_37] : memref<10x10x8xf32, #tpu.memory_space<vmem>>, vector<4x8x8xf32>
    %57 = vector.shape_cast %56 : vector<4x8x8xf32> to vector<32x8xf32>
    %c6 = arith.constant 6 : index
    %c0_38 = arith.constant 0 : index
    %c0_39 = arith.constant 0 : index
    %58 = vector.load %arg3[%c6, %c0_38, %c0_39] : memref<9x8x8xf32, #tpu.memory_space<vmem>>, vector<1x8x8xf32>
    %59 = vector.shape_cast %58 : vector<1x8x8xf32> to vector<8x8xf32>
    %cst_40 = arith.constant dense<0.000000e+00> : vector<32x8xf32>
    %60 = tpu.matmul %57, %59, %cst_40 {dimension_numbers = #tpu.dot_dimension_numbers<[1], [0], [0], [1], [0, 0, 1, 1], [], []>} : vector<32x8xf32>, vector<8x8xf32>, vector<32x8xf32> -> vector<32x8xf32>
    %61 = arith.addf %53, %60 : vector<32x8xf32>
    %c2_i32_41 = arith.constant 2 : i32
    %62 = arith.addi %4, %c2_i32_41 : i32
    %63 = arith.index_cast %62 : i32 to index
    %c1_42 = arith.constant 1 : index
    %c0_43 = arith.constant 0 : index
    %64 = vector.load %arg8[%63, %c1_42, %c0_43] : memref<10x10x8xf32, #tpu.memory_space<vmem>>, vector<4x8x8xf32>
    %65 = vector.shape_cast %64 : vector<4x8x8xf32> to vector<32x8xf32>
    %c7 = arith.constant 7 : index
    %c0_44 = arith.constant 0 : index
    %c0_45 = arith.constant 0 : index
    %66 = vector.load %arg3[%c7, %c0_44, %c0_45] : memref<9x8x8xf32, #tpu.memory_space<vmem>>, vector<1x8x8xf32>
    %67 = vector.shape_cast %66 : vector<1x8x8xf32> to vector<8x8xf32>
    %cst_46 = arith.constant dense<0.000000e+00> : vector<32x8xf32>
    %68 = tpu.matmul %65, %67, %cst_46 {dimension_numbers = #tpu.dot_dimension_numbers<[1], [0], [0], [1], [0, 0, 1, 1], [], []>} : vector<32x8xf32>, vector<8x8xf32>, vector<32x8xf32> -> vector<32x8xf32>
    %69 = arith.addf %61, %68 : vector<32x8xf32>
    %c2_i32_47 = arith.constant 2 : i32
    %70 = arith.addi %4, %c2_i32_47 : i32
    %71 = arith.index_cast %70 : i32 to index
    %c2_48 = arith.constant 2 : index
    %c0_49 = arith.constant 0 : index
    %72 = vector.load %arg8[%71, %c2_48, %c0_49] : memref<10x10x8xf32, #tpu.memory_space<vmem>>, vector<4x8x8xf32>
    %73 = vector.shape_cast %72 : vector<4x8x8xf32> to vector<32x8xf32>
    %c8 = arith.constant 8 : index
    %c0_50 = arith.constant 0 : index
    %c0_51 = arith.constant 0 : index
    %74 = vector.load %arg3[%c8, %c0_50, %c0_51] : memref<9x8x8xf32, #tpu.memory_space<vmem>>, vector<1x8x8xf32>
    %75 = vector.shape_cast %74 : vector<1x8x8xf32> to vector<8x8xf32>
    %cst_52 = arith.constant dense<0.000000e+00> : vector<32x8xf32>
    %76 = tpu.matmul %73, %75, %cst_52 {dimension_numbers = #tpu.dot_dimension_numbers<[1], [0], [0], [1], [0, 0, 1, 1], [], []>} : vector<32x8xf32>, vector<8x8xf32>, vector<32x8xf32> -> vector<32x8xf32>
    %77 = arith.addf %69, %76 : vector<32x8xf32>
    %c0_53 = arith.constant 0 : index
    %c0_54 = arith.constant 0 : index
    %c0_55 = arith.constant 0 : index
    %c0_56 = arith.constant 0 : index
    %78 = vector.load %arg5[%c0_53, %c0_54, %c0_55, %c0_56] : memref<1x1x32x8xf32, #tpu.memory_space<vmem>>, vector<1x1x32x8xf32>
    %79 = vector.shape_cast %78 : vector<1x1x32x8xf32> to vector<32x8xf32>
    %80 = vector.shape_cast %77 : vector<32x8xf32> to vector<1x1x32x8xf32>
    tpu.vector_store %arg5[%c0_53, %c0_54, %c0_55, %c0_56], %80 {strides = array<i32>} : memref<1x1x32x8xf32, #tpu.memory_space<vmem>>, vector<1x1x32x8xf32>,
    %cst_57 = arith.constant dense<0.000000e+00> : vector<8xf32>
    %81 = vector.multi_reduction <add>, %77, %cst_57 [0] : vector<32x8xf32> to vector<8xf32>
    %82 = vector.shape_cast %81 : vector<8xf32> to vector<1x8xf32>
    %c0_58 = arith.constant 0 : index
    %c0_59 = arith.constant 0 : index
    %c0_60 = arith.constant 0 : index
    %c0_61 = arith.constant 0 : index
    %83 = vector.load %arg6[%c0_58, %c0_59, %c0_60, %c0_61] : memref<1x1x1x8xf32, #tpu.memory_space<vmem>>, vector<1x1x1x8xf32>
    %84 = vector.shape_cast %83 : vector<1x1x1x8xf32> to vector<1x8xf32>
    %85 = vector.shape_cast %82 : vector<1x8xf32> to vector<1x1x1x8xf32>
    tpu.vector_store %arg6[%c0_58, %c0_59, %c0_60, %c0_61], %85 {strides = array<i32>} : memref<1x1x1x8xf32, #tpu.memory_space<vmem>>, vector<1x1x1x8xf32>,
    %86 = arith.mulf %77, %77 : vector<32x8xf32>
    %cst_62 = arith.constant dense<0.000000e+00> : vector<8xf32>
    %87 = vector.multi_reduction <add>, %86, %cst_62 [0] : vector<32x8xf32> to vector<8xf32>
    %88 = vector.shape_cast %87 : vector<8xf32> to vector<1x8xf32>
    %c0_63 = arith.constant 0 : index
    %c0_64 = arith.constant 0 : index
    %c0_65 = arith.constant 0 : index
    %c0_66 = arith.constant 0 : index
    %89 = vector.load %arg7[%c0_63, %c0_64, %c0_65, %c0_66] : memref<1x1x1x8xf32, #tpu.memory_space<vmem>>, vector<1x1x1x8xf32>
    %90 = vector.shape_cast %89 : vector<1x1x1x8xf32> to vector<1x8xf32>
    %91 = vector.shape_cast %88 : vector<1x8xf32> to vector<1x1x1x8xf32>
    tpu.vector_store %arg7[%c0_63, %c0_64, %c0_65, %c0_66], %91 {strides = array<i32>} : memref<1x1x1x8xf32, #tpu.memory_space<vmem>>, vector<1x1x1x8xf32>,
    return
  }
  func.func @transform_0(%arg0: i32, %arg1: i32) -> (i32, i32, i32, i32) {
    %c0_i32 = arith.constant 0 : i32
    %c0_i32_0 = arith.constant 0 : i32
    %c0_i32_1 = arith.constant 0 : i32
    %c0_i32_2 = arith.constant 0 : i32
    return %arg0, %c0_i32, %c0_i32_0, %c0_i32_1 : i32, i32, i32, i32
  }
  func.func @transform_1(%arg0: i32, %arg1: i32) -> (i32, i32, i32) {
    %c0_i32 = arith.constant 0 : i32
    %c0_i32_0 = arith.constant 0 : i32
    %c0_i32_1 = arith.constant 0 : i32
    %c0_i32_2 = arith.constant 0 : i32
    return %c0_i32, %c0_i32_0, %c0_i32_1 : i32, i32, i32
  }
  func.func @transform_2(%arg0: i32, %arg1: i32) -> (i32, i32) {
    %c0_i32 = arith.constant 0 : i32
    %c0_i32_0 = arith.constant 0 : i32
    %c0_i32_1 = arith.constant 0 : i32
    return %c0_i32, %c0_i32_0 : i32, i32
  }
  func.func @transform_3(%arg0: i32, %arg1: i32) -> (i32, i32, i32, i32) {
    %c0_i32 = arith.constant 0 : i32
    %c0_i32_0 = arith.constant 0 : i32
    %c0_i32_1 = arith.constant 0 : i32
    return %arg0, %arg1, %c0_i32, %c0_i32_0 : i32, i32, i32, i32
  }
  func.func @transform_4(%arg0: i32, %arg1: i32) -> (i32, i32, i32, i32) {
    %c0_i32 = arith.constant 0 : i32
    %c0_i32_0 = arith.constant 0 : i32
    %c0_i32_1 = arith.constant 0 : i32
    return %arg0, %arg1, %c0_i32, %c0_i32_0 : i32, i32, i32, i32
  }
  func.func @transform_5(%arg0: i32, %arg1: i32) -> (i32, i32, i32, i32) {
    %c0_i32 = arith.constant 0 : i32
    %c0_i32_0 = arith.constant 0 : i32
    %c0_i32_1 = arith.constant 0 : i32
    return %arg0, %arg1, %c0_i32, %c0_i32_0 : i32, i32, i32, i32
  }
}

module attributes {stable_mosaic.version = 11 : i64} {
  func.func @_conv_bn_kernel(%arg0: i32, %arg1: i32, %arg2: memref<1x9x9x16xf32, #tpu.memory_space<vmem>>, %arg3: memref<4x16x8xf32, #tpu.memory_space<vmem>>, %arg4: memref<1x1x32x8xf32, #tpu.memory_space<vmem>>, %arg5: memref<1x1x1x8xf32, #tpu.memory_space<vmem>>, %arg6: memref<1x1x1x8xf32, #tpu.memory_space<vmem>>) attributes {dimension_semantics = [#tpu.dimension_semantics<parallel>, #tpu.dimension_semantics<arbitrary>], iteration_bounds = array<i64: 2, 2>, scalar_prefetch = 0 : i64, scratch_operands = 0 : i64, tpu.core_type = #tpu.core_type<tc>, window_params = [{transform_indices = @transform_0, window_bounds = array<i64: 1, 9, 9, 16>}, {pipeline_mode = #tpu.pipeline_mode<synchronous>, transform_indices = @transform_1, window_bounds = array<i64: 4, 16, 8>}, {transform_indices = @transform_2, window_bounds = array<i64: 1, 1, 32, 8>}, {transform_indices = @transform_3, window_bounds = array<i64: 1, 1, 1, 8>}, {transform_indices = @transform_4, window_bounds = array<i64: 1, 1, 1, 8>}]} {
    %c4_i32 = arith.constant 4 : i32
    %0 = arith.muli %arg1, %c4_i32 : i32
    %1 = tpu.assume_multiple %0, 4 : i32
    %cst = arith.constant 0.000000e+00 : f32
    %2 = vector.broadcast %cst : f32 to vector<32x8xf32>
    %c0_i32 = arith.constant 0 : i32
    %3 = arith.addi %1, %c0_i32 : i32
    %c0 = arith.constant 0 : index
    %4 = arith.index_cast %3 : i32 to index
    %c0_0 = arith.constant 0 : index
    %c0_1 = arith.constant 0 : index
    %5 = vector.load %arg2[%c0, %4, %c0_0, %c0_1] : memref<1x9x9x16xf32, #tpu.memory_space<vmem>>, vector<1x4x8x16xf32>
    %6 = vector.shape_cast %5 : vector<1x4x8x16xf32> to vector<4x8x16xf32>
    %7 = vector.shape_cast %6 : vector<4x8x16xf32> to vector<32x16xf32>
    %c0_2 = arith.constant 0 : index
    %c0_3 = arith.constant 0 : index
    %c0_4 = arith.constant 0 : index
    %8 = vector.load %arg3[%c0_2, %c0_3, %c0_4] : memref<4x16x8xf32, #tpu.memory_space<vmem>>, vector<1x16x8xf32>
    %9 = vector.shape_cast %8 : vector<1x16x8xf32> to vector<16x8xf32>
    %cst_5 = arith.constant dense<0.000000e+00> : vector<32x8xf32>
    %10 = tpu.matmul %7, %9, %cst_5 {dimension_numbers = #tpu.dot_dimension_numbers<[1], [0], [0], [1], [0, 0, 1, 1], [], []>} : vector<32x16xf32>, vector<16x8xf32>, vector<32x8xf32> -> vector<32x8xf32>
    %11 = arith.addf %2, %10 : vector<32x8xf32>
    %c0_i32_6 = arith.constant 0 : i32
    %12 = arith.addi %1, %c0_i32_6 : i32
    %c0_7 = arith.constant 0 : index
    %13 = arith.index_cast %12 : i32 to index
    %c1 = arith.constant 1 : index
    %c0_8 = arith.constant 0 : index
    %14 = vector.load %arg2[%c0_7, %13, %c1, %c0_8] : memref<1x9x9x16xf32, #tpu.memory_space<vmem>>, vector<1x4x8x16xf32>
    %15 = vector.shape_cast %14 : vector<1x4x8x16xf32> to vector<4x8x16xf32>
    %16 = vector.shape_cast %15 : vector<4x8x16xf32> to vector<32x16xf32>
    %c1_9 = arith.constant 1 : index
    %c0_10 = arith.constant 0 : index
    %c0_11 = arith.constant 0 : index
    %17 = vector.load %arg3[%c1_9, %c0_10, %c0_11] : memref<4x16x8xf32, #tpu.memory_space<vmem>>, vector<1x16x8xf32>
    %18 = vector.shape_cast %17 : vector<1x16x8xf32> to vector<16x8xf32>
    %cst_12 = arith.constant dense<0.000000e+00> : vector<32x8xf32>
    %19 = tpu.matmul %16, %18, %cst_12 {dimension_numbers = #tpu.dot_dimension_numbers<[1], [0], [0], [1], [0, 0, 1, 1], [], []>} : vector<32x16xf32>, vector<16x8xf32>, vector<32x8xf32> -> vector<32x8xf32>
    %20 = arith.addf %11, %19 : vector<32x8xf32>
    %c1_i32 = arith.constant 1 : i32
    %21 = arith.addi %1, %c1_i32 : i32
    %c0_13 = arith.constant 0 : index
    %22 = arith.index_cast %21 : i32 to index
    %c0_14 = arith.constant 0 : index
    %c0_15 = arith.constant 0 : index
    %23 = vector.load %arg2[%c0_13, %22, %c0_14, %c0_15] : memref<1x9x9x16xf32, #tpu.memory_space<vmem>>, vector<1x4x8x16xf32>
    %24 = vector.shape_cast %23 : vector<1x4x8x16xf32> to vector<4x8x16xf32>
    %25 = vector.shape_cast %24 : vector<4x8x16xf32> to vector<32x16xf32>
    %c2 = arith.constant 2 : index
    %c0_16 = arith.constant 0 : index
    %c0_17 = arith.constant 0 : index
    %26 = vector.load %arg3[%c2, %c0_16, %c0_17] : memref<4x16x8xf32, #tpu.memory_space<vmem>>, vector<1x16x8xf32>
    %27 = vector.shape_cast %26 : vector<1x16x8xf32> to vector<16x8xf32>
    %cst_18 = arith.constant dense<0.000000e+00> : vector<32x8xf32>
    %28 = tpu.matmul %25, %27, %cst_18 {dimension_numbers = #tpu.dot_dimension_numbers<[1], [0], [0], [1], [0, 0, 1, 1], [], []>} : vector<32x16xf32>, vector<16x8xf32>, vector<32x8xf32> -> vector<32x8xf32>
    %29 = arith.addf %20, %28 : vector<32x8xf32>
    %c1_i32_19 = arith.constant 1 : i32
    %30 = arith.addi %1, %c1_i32_19 : i32
    %c0_20 = arith.constant 0 : index
    %31 = arith.index_cast %30 : i32 to index
    %c1_21 = arith.constant 1 : index
    %c0_22 = arith.constant 0 : index
    %32 = vector.load %arg2[%c0_20, %31, %c1_21, %c0_22] : memref<1x9x9x16xf32, #tpu.memory_space<vmem>>, vector<1x4x8x16xf32>
    %33 = vector.shape_cast %32 : vector<1x4x8x16xf32> to vector<4x8x16xf32>
    %34 = vector.shape_cast %33 : vector<4x8x16xf32> to vector<32x16xf32>
    %c3 = arith.constant 3 : index
    %c0_23 = arith.constant 0 : index
    %c0_24 = arith.constant 0 : index
    %35 = vector.load %arg3[%c3, %c0_23, %c0_24] : memref<4x16x8xf32, #tpu.memory_space<vmem>>, vector<1x16x8xf32>
    %36 = vector.shape_cast %35 : vector<1x16x8xf32> to vector<16x8xf32>
    %cst_25 = arith.constant dense<0.000000e+00> : vector<32x8xf32>
    %37 = tpu.matmul %34, %36, %cst_25 {dimension_numbers = #tpu.dot_dimension_numbers<[1], [0], [0], [1], [0, 0, 1, 1], [], []>} : vector<32x16xf32>, vector<16x8xf32>, vector<32x8xf32> -> vector<32x8xf32>
    %38 = arith.addf %29, %37 : vector<32x8xf32>
    %c0_26 = arith.constant 0 : index
    %c0_27 = arith.constant 0 : index
    %c0_28 = arith.constant 0 : index
    %c0_29 = arith.constant 0 : index
    %39 = vector.load %arg4[%c0_26, %c0_27, %c0_28, %c0_29] : memref<1x1x32x8xf32, #tpu.memory_space<vmem>>, vector<1x1x32x8xf32>
    %40 = vector.shape_cast %39 : vector<1x1x32x8xf32> to vector<32x8xf32>
    %41 = vector.shape_cast %38 : vector<32x8xf32> to vector<1x1x32x8xf32>
    tpu.vector_store %arg4[%c0_26, %c0_27, %c0_28, %c0_29], %41 {strides = array<i32>} : memref<1x1x32x8xf32, #tpu.memory_space<vmem>>, vector<1x1x32x8xf32>,
    %cst_30 = arith.constant dense<0.000000e+00> : vector<8xf32>
    %42 = vector.multi_reduction <add>, %38, %cst_30 [0] : vector<32x8xf32> to vector<8xf32>
    %43 = vector.shape_cast %42 : vector<8xf32> to vector<1x8xf32>
    %c0_31 = arith.constant 0 : index
    %c0_32 = arith.constant 0 : index
    %c0_33 = arith.constant 0 : index
    %c0_34 = arith.constant 0 : index
    %44 = vector.load %arg5[%c0_31, %c0_32, %c0_33, %c0_34] : memref<1x1x1x8xf32, #tpu.memory_space<vmem>>, vector<1x1x1x8xf32>
    %45 = vector.shape_cast %44 : vector<1x1x1x8xf32> to vector<1x8xf32>
    %46 = vector.shape_cast %43 : vector<1x8xf32> to vector<1x1x1x8xf32>
    tpu.vector_store %arg5[%c0_31, %c0_32, %c0_33, %c0_34], %46 {strides = array<i32>} : memref<1x1x1x8xf32, #tpu.memory_space<vmem>>, vector<1x1x1x8xf32>,
    %47 = arith.mulf %38, %38 : vector<32x8xf32>
    %cst_35 = arith.constant dense<0.000000e+00> : vector<8xf32>
    %48 = vector.multi_reduction <add>, %47, %cst_35 [0] : vector<32x8xf32> to vector<8xf32>
    %49 = vector.shape_cast %48 : vector<8xf32> to vector<1x8xf32>
    %c0_36 = arith.constant 0 : index
    %c0_37 = arith.constant 0 : index
    %c0_38 = arith.constant 0 : index
    %c0_39 = arith.constant 0 : index
    %50 = vector.load %arg6[%c0_36, %c0_37, %c0_38, %c0_39] : memref<1x1x1x8xf32, #tpu.memory_space<vmem>>, vector<1x1x1x8xf32>
    %51 = vector.shape_cast %50 : vector<1x1x1x8xf32> to vector<1x8xf32>
    %52 = vector.shape_cast %49 : vector<1x8xf32> to vector<1x1x1x8xf32>
    tpu.vector_store %arg6[%c0_36, %c0_37, %c0_38, %c0_39], %52 {strides = array<i32>} : memref<1x1x1x8xf32, #tpu.memory_space<vmem>>, vector<1x1x1x8xf32>,
    return
  }
  func.func @transform_0(%arg0: i32, %arg1: i32) -> (i32, i32, i32, i32) {
    %c0_i32 = arith.constant 0 : i32
    %c0_i32_0 = arith.constant 0 : i32
    %c0_i32_1 = arith.constant 0 : i32
    %c0_i32_2 = arith.constant 0 : i32
    return %arg0, %c0_i32, %c0_i32_0, %c0_i32_1 : i32, i32, i32, i32
  }
  func.func @transform_1(%arg0: i32, %arg1: i32) -> (i32, i32, i32) {
    %c0_i32 = arith.constant 0 : i32
    %c0_i32_0 = arith.constant 0 : i32
    %c0_i32_1 = arith.constant 0 : i32
    %c0_i32_2 = arith.constant 0 : i32
    return %c0_i32, %c0_i32_0, %c0_i32_1 : i32, i32, i32
  }
  func.func @transform_2(%arg0: i32, %arg1: i32) -> (i32, i32, i32, i32) {
    %c0_i32 = arith.constant 0 : i32
    %c0_i32_0 = arith.constant 0 : i32
    %c0_i32_1 = arith.constant 0 : i32
    return %arg0, %arg1, %c0_i32, %c0_i32_0 : i32, i32, i32, i32
  }
  func.func @transform_3(%arg0: i32, %arg1: i32) -> (i32, i32, i32, i32) {
    %c0_i32 = arith.constant 0 : i32
    %c0_i32_0 = arith.constant 0 : i32
    %c0_i32_1 = arith.constant 0 : i32
    return %arg0, %arg1, %c0_i32, %c0_i32_0 : i32, i32, i32, i32
  }
  func.func @transform_4(%arg0: i32, %arg1: i32) -> (i32, i32, i32, i32) {
    %c0_i32 = arith.constant 0 : i32
    %c0_i32_0 = arith.constant 0 : i32
    %c0_i32_1 = arith.constant 0 : i32
    return %arg0, %arg1, %c0_i32, %c0_i32_0 : i32, i32, i32, i32
  }
}

module attributes {stable_mosaic.version = 11 : i64} {
  func.func @_conv_bn_kernel(%arg0: i32, %arg1: i32, %arg2: memref<1x9x9x16xf32, #tpu.memory_space<vmem>>, %arg3: memref<1x16x8xf32, #tpu.memory_space<vmem>>, %arg4: memref<1x1x32x8xf32, #tpu.memory_space<vmem>>, %arg5: memref<1x1x1x8xf32, #tpu.memory_space<vmem>>, %arg6: memref<1x1x1x8xf32, #tpu.memory_space<vmem>>) attributes {dimension_semantics = [#tpu.dimension_semantics<parallel>, #tpu.dimension_semantics<arbitrary>], iteration_bounds = array<i64: 2, 2>, scalar_prefetch = 0 : i64, scratch_operands = 0 : i64, tpu.core_type = #tpu.core_type<tc>, window_params = [{transform_indices = @transform_0, window_bounds = array<i64: 1, 9, 9, 16>}, {pipeline_mode = #tpu.pipeline_mode<synchronous>, transform_indices = @transform_1, window_bounds = array<i64: 1, 16, 8>}, {transform_indices = @transform_2, window_bounds = array<i64: 1, 1, 32, 8>}, {transform_indices = @transform_3, window_bounds = array<i64: 1, 1, 1, 8>}, {transform_indices = @transform_4, window_bounds = array<i64: 1, 1, 1, 8>}]} {
    %c4_i32 = arith.constant 4 : i32
    %0 = arith.muli %arg1, %c4_i32 : i32
    %1 = tpu.assume_multiple %0, 4 : i32
    %cst = arith.constant 0.000000e+00 : f32
    %2 = vector.broadcast %cst : f32 to vector<32x8xf32>
    %c0_i32 = arith.constant 0 : i32
    %3 = arith.addi %1, %c0_i32 : i32
    %c0 = arith.constant 0 : index
    %4 = arith.index_cast %3 : i32 to index
    %c0_0 = arith.constant 0 : index
    %c0_1 = arith.constant 0 : index
    %5 = vector.load %arg2[%c0, %4, %c0_0, %c0_1] : memref<1x9x9x16xf32, #tpu.memory_space<vmem>>, vector<1x4x8x16xf32>
    %6 = vector.shape_cast %5 : vector<1x4x8x16xf32> to vector<4x8x16xf32>
    %7 = vector.shape_cast %6 : vector<4x8x16xf32> to vector<32x16xf32>
    %c0_2 = arith.constant 0 : index
    %c0_3 = arith.constant 0 : index
    %c0_4 = arith.constant 0 : index
    %8 = vector.load %arg3[%c0_2, %c0_3, %c0_4] : memref<1x16x8xf32, #tpu.memory_space<vmem>>, vector<1x16x8xf32>
    %9 = vector.shape_cast %8 : vector<1x16x8xf32> to vector<16x8xf32>
    %cst_5 = arith.constant dense<0.000000e+00> : vector<32x8xf32>
    %10 = tpu.matmul %7, %9, %cst_5 {dimension_numbers = #tpu.dot_dimension_numbers<[1], [0], [0], [1], [0, 0, 1, 1], [], []>} : vector<32x16xf32>, vector<16x8xf32>, vector<32x8xf32> -> vector<32x8xf32>
    %11 = arith.addf %2, %10 : vector<32x8xf32>
    %c0_6 = arith.constant 0 : index
    %c0_7 = arith.constant 0 : index
    %c0_8 = arith.constant 0 : index
    %c0_9 = arith.constant 0 : index
    %12 = vector.load %arg4[%c0_6, %c0_7, %c0_8, %c0_9] : memref<1x1x32x8xf32, #tpu.memory_space<vmem>>, vector<1x1x32x8xf32>
    %13 = vector.shape_cast %12 : vector<1x1x32x8xf32> to vector<32x8xf32>
    %14 = vector.shape_cast %11 : vector<32x8xf32> to vector<1x1x32x8xf32>
    tpu.vector_store %arg4[%c0_6, %c0_7, %c0_8, %c0_9], %14 {strides = array<i32>} : memref<1x1x32x8xf32, #tpu.memory_space<vmem>>, vector<1x1x32x8xf32>,
    %cst_10 = arith.constant dense<0.000000e+00> : vector<8xf32>
    %15 = vector.multi_reduction <add>, %11, %cst_10 [0] : vector<32x8xf32> to vector<8xf32>
    %16 = vector.shape_cast %15 : vector<8xf32> to vector<1x8xf32>
    %c0_11 = arith.constant 0 : index
    %c0_12 = arith.constant 0 : index
    %c0_13 = arith.constant 0 : index
    %c0_14 = arith.constant 0 : index
    %17 = vector.load %arg5[%c0_11, %c0_12, %c0_13, %c0_14] : memref<1x1x1x8xf32, #tpu.memory_space<vmem>>, vector<1x1x1x8xf32>
    %18 = vector.shape_cast %17 : vector<1x1x1x8xf32> to vector<1x8xf32>
    %19 = vector.shape_cast %16 : vector<1x8xf32> to vector<1x1x1x8xf32>
    tpu.vector_store %arg5[%c0_11, %c0_12, %c0_13, %c0_14], %19 {strides = array<i32>} : memref<1x1x1x8xf32, #tpu.memory_space<vmem>>, vector<1x1x1x8xf32>,
    %20 = arith.mulf %11, %11 : vector<32x8xf32>
    %cst_15 = arith.constant dense<0.000000e+00> : vector<8xf32>
    %21 = vector.multi_reduction <add>, %20, %cst_15 [0] : vector<32x8xf32> to vector<8xf32>
    %22 = vector.shape_cast %21 : vector<8xf32> to vector<1x8xf32>
    %c0_16 = arith.constant 0 : index
    %c0_17 = arith.constant 0 : index
    %c0_18 = arith.constant 0 : index
    %c0_19 = arith.constant 0 : index
    %23 = vector.load %arg6[%c0_16, %c0_17, %c0_18, %c0_19] : memref<1x1x1x8xf32, #tpu.memory_space<vmem>>, vector<1x1x1x8xf32>
    %24 = vector.shape_cast %23 : vector<1x1x1x8xf32> to vector<1x8xf32>
    %25 = vector.shape_cast %22 : vector<1x8xf32> to vector<1x1x1x8xf32>
    tpu.vector_store %arg6[%c0_16, %c0_17, %c0_18, %c0_19], %25 {strides = array<i32>} : memref<1x1x1x8xf32, #tpu.memory_space<vmem>>, vector<1x1x1x8xf32>,
    return
  }
  func.func @transform_0(%arg0: i32, %arg1: i32) -> (i32, i32, i32, i32) {
    %c0_i32 = arith.constant 0 : i32
    %c0_i32_0 = arith.constant 0 : i32
    %c0_i32_1 = arith.constant 0 : i32
    %c0_i32_2 = arith.constant 0 : i32
    return %arg0, %c0_i32, %c0_i32_0, %c0_i32_1 : i32, i32, i32, i32
  }
  func.func @transform_1(%arg0: i32, %arg1: i32) -> (i32, i32, i32) {
    %c0_i32 = arith.constant 0 : i32
    %c0_i32_0 = arith.constant 0 : i32
    %c0_i32_1 = arith.constant 0 : i32
    %c0_i32_2 = arith.constant 0 : i32
    return %c0_i32, %c0_i32_0, %c0_i32_1 : i32, i32, i32
  }
  func.func @transform_2(%arg0: i32, %arg1: i32) -> (i32, i32, i32, i32) {
    %c0_i32 = arith.constant 0 : i32
    %c0_i32_0 = arith.constant 0 : i32
    %c0_i32_1 = arith.constant 0 : i32
    return %arg0, %arg1, %c0_i32, %c0_i32_0 : i32, i32, i32, i32
  }
  func.func @transform_3(%arg0: i32, %arg1: i32) -> (i32, i32, i32, i32) {
    %c0_i32 = arith.constant 0 : i32
    %c0_i32_0 = arith.constant 0 : i32
    %c0_i32_1 = arith.constant 0 : i32
    return %arg0, %arg1, %c0_i32, %c0_i32_0 : i32, i32, i32, i32
  }
  func.func @transform_4(%arg0: i32, %arg1: i32) -> (i32, i32, i32, i32) {
    %c0_i32 = arith.constant 0 : i32
    %c0_i32_0 = arith.constant 0 : i32
    %c0_i32_1 = arith.constant 0 : i32
    return %arg0, %arg1, %c0_i32, %c0_i32_0 : i32, i32, i32, i32
  }
}

module attributes {stable_mosaic.version = 11 : i64} {
  func.func @_bn_add_relu_kernel(%arg0: i32, %arg1: memref<2x512xf32, #tpu.memory_space<vmem>>, %arg2: memref<2x512xf32, #tpu.memory_space<vmem>>, %arg3: memref<4x512xf32, #tpu.memory_space<vmem>>, %arg4: memref<2x512xf32, #tpu.memory_space<vmem>>) attributes {dimension_semantics = [#tpu.dimension_semantics<parallel>], iteration_bounds = array<i64: 1>, scalar_prefetch = 0 : i64, scratch_operands = 0 : i64, tpu.core_type = #tpu.core_type<tc>, window_params = [{transform_indices = @transform_0, window_bounds = array<i64: 2, 512>}, {transform_indices = @transform_1, window_bounds = array<i64: 2, 512>}, {pipeline_mode = #tpu.pipeline_mode<synchronous>, transform_indices = @transform_2, window_bounds = array<i64: 4, 512>}, {transform_indices = @transform_3, window_bounds = array<i64: 2, 512>}]} {
    %c0 = arith.constant 0 : index
    %c0_0 = arith.constant 0 : index
    %0 = vector.load %arg1[%c0, %c0_0] : memref<2x512xf32, #tpu.memory_space<vmem>>, vector<2x512xf32>
    %c0_1 = arith.constant 0 : index
    %c0_2 = arith.constant 0 : index
    %1 = vector.load %arg3[%c0_1, %c0_2] : memref<4x512xf32, #tpu.memory_space<vmem>>, vector<1x512xf32>
    %2 = vector.broadcast %1 : vector<1x512xf32> to vector<2x512xf32>
    %3 = arith.mulf %0, %2 : vector<2x512xf32>
    %c1 = arith.constant 1 : index
    %c0_3 = arith.constant 0 : index
    %4 = vector.load %arg3[%c1, %c0_3] : memref<4x512xf32, #tpu.memory_space<vmem>>, vector<1x512xf32>
    %5 = vector.broadcast %4 : vector<1x512xf32> to vector<2x512xf32>
    %6 = arith.addf %3, %5 : vector<2x512xf32>
    %c0_4 = arith.constant 0 : index
    %c0_5 = arith.constant 0 : index
    %7 = vector.load %arg2[%c0_4, %c0_5] : memref<2x512xf32, #tpu.memory_space<vmem>>, vector<2x512xf32>
    %c2 = arith.constant 2 : index
    %c0_6 = arith.constant 0 : index
    %8 = vector.load %arg3[%c2, %c0_6] : memref<4x512xf32, #tpu.memory_space<vmem>>, vector<1x512xf32>
    %9 = vector.broadcast %8 : vector<1x512xf32> to vector<2x512xf32>
    %10 = arith.mulf %7, %9 : vector<2x512xf32>
    %c3 = arith.constant 3 : index
    %c0_7 = arith.constant 0 : index
    %11 = vector.load %arg3[%c3, %c0_7] : memref<4x512xf32, #tpu.memory_space<vmem>>, vector<1x512xf32>
    %12 = vector.broadcast %11 : vector<1x512xf32> to vector<2x512xf32>
    %13 = arith.addf %10, %12 : vector<2x512xf32>
    %14 = arith.addf %6, %13 : vector<2x512xf32>
    %cst = arith.constant 0.000000e+00 : f32
    %15 = vector.broadcast %cst : f32 to vector<2x512xf32>
    %16 = arith.maximumf %14, %15 : vector<2x512xf32>
    %c0_8 = arith.constant 0 : index
    %c0_9 = arith.constant 0 : index
    %17 = vector.load %arg4[%c0_8, %c0_9] : memref<2x512xf32, #tpu.memory_space<vmem>>, vector<2x512xf32>
    tpu.vector_store %arg4[%c0_8, %c0_9], %16 {strides = array<i32>} : memref<2x512xf32, #tpu.memory_space<vmem>>, vector<2x512xf32>,
    return
  }
  func.func @transform_0(%arg0: i32) -> (i32, i32) {
    %c0_i32 = arith.constant 0 : i32
    %c0_i32_0 = arith.constant 0 : i32
    return %arg0, %c0_i32 : i32, i32
  }
  func.func @transform_1(%arg0: i32) -> (i32, i32) {
    %c0_i32 = arith.constant 0 : i32
    %c0_i32_0 = arith.constant 0 : i32
    return %arg0, %c0_i32 : i32, i32
  }
  func.func @transform_2(%arg0: i32) -> (i32, i32) {
    %c0_i32 = arith.constant 0 : i32
    %c0_i32_0 = arith.constant 0 : i32
    %c0_i32_1 = arith.constant 0 : i32
    return %c0_i32, %c0_i32_0 : i32, i32
  }
  func.func @transform_3(%arg0: i32) -> (i32, i32) {
    %c0_i32 = arith.constant 0 : i32
    %c0_i32_0 = arith.constant 0 : i32
    return %arg0, %c0_i32 : i32, i32
  }
}

</mosaic_0001>

<bundles_post_ra>
// kernel: tile.35
= control target key start
LH: loop header
LB: loop body
LE: loop exit
PB: predicated region body
PF: predicated region fallthrough
CT: control target
= control target key end

     0   :  { %s64_s0 = inlined_call_operand.vmem [shape: f32[8], index: 0, kind: input, shape index: {}]   ;;  %s65_s1 = inlined_call_operand.vmem [shape: f32[64,8], index: 1, kind: output, shape index: {}]  }
   0x1   :  { %v4_v0 = vld [vmem:[%s64_s0] ss:$0 sm:$0xff] }
   0x2   :  { %5 = vst [vmem:[%s65_s1] sm:$0xff] %v4_v0  ;;  %20 = vst [vmem:[%s65_s1 + $0x8] sm:$0xff] %v4_v0 }
   0x3   :  { %21 = vst [vmem:[%s65_s1 + $0x10] sm:$0xff] %v4_v0  ;;  %22 = vst [vmem:[%s65_s1 + $0x18] sm:$0xff] %v4_v0 }
   0x4   :  { %23 = vst [vmem:[%s65_s1 + $0x20] sm:$0xff] %v4_v0  ;;  %24 = vst [vmem:[%s65_s1 + $0x28] sm:$0xff] %v4_v0 }
   0x5   :  { %25 = vst [vmem:[%s65_s1 + $0x30] sm:$0xff] %v4_v0  ;;  %26 = vst [vmem:[%s65_s1 + $0x38] sm:$0xff] %v4_v0 }

// kernel: tile.39
= control target key start
LH: loop header
LB: loop body
LE: loop exit
PB: predicated region body
PF: predicated region fallthrough
CT: control target
= control target key end

     0   :  { %vm6_vm0 = vcmask 1043458   ;;  %s11_s6 = smov 3  ;;  %s14_s7 = smov 12  ;;  %vm8_vm1 = vcmask 64512   ;;  %vm20_vm2 = vcmask 1048512   ;;  %vm32_vm3 = vcmask 982912   ;;  %s417_s0 = inlined_call_operand.vmem [shape: f32[64,8], index: 0, kind: input, shape index: {}]   ;;  %s418_s1 = inlined_call_operand.vmem [shape: f32[1,512], index: 1, kind: output, shape index: {}]  }
   0x1   :  { %v220_v0 = vld [vmem:[%s417_s0 + $0xf] ss:$16 sm:%s11_s6]   ;;  %s35_s12 = smov 3  ;;  %s38_s15 = smov 12  ;;  %vm44_vm4 = vcmask 917312   ;;  %vm56_vm5 = vcmask 851712  }
   0x2   :  { %v221_v1 = vld [vmem:[%s417_s0 + $0xf] ss:$16 sm:%s14_s7]   ;;  %v224_v3 = vld [vmem:[%s417_s0 + $0xd] ss:$16 sm:%s35_s12]   ;;  %s268_s16 = smov 120   ;;  %s23_s19 = smov 3 }
   0x3   :  { %v17_v2 = vsel %vm6_vm0, %v221_v1, %v220_v0  ;;  %v225_v4 = vld [vmem:[%s417_s0 + $0xd] ss:$16 sm:%s38_s15]   ;;  %s26_s20 = smov 12  ;;  %v222_v6 = vld [vmem:[%s417_s0 + $0xe] ss:$16 sm:%s23_s19]   ;;  %s47_s25 = smov 3 }
   0x4   :  { %18 = vrot.lane.b32.xlu0 %v17_v2, %s268_s16  ;;  %v41_v5 = vsel %vm6_vm0, %v225_v4, %v224_v3  ;;  %v223_v7 = vld [vmem:[%s417_s0 + $0xe] ss:$16 sm:%s26_s20]   ;;  %s269_s26 = smov 104   ;;  %s50_s29 = smov 12  ;;  %vm68_vm6 = vcmask 786112   ;;  %vm80_vm7 = vcmask 720512  }
   0x5   :  { %42 = vrot.lane.b32.xlu1 %v41_v5, %s269_s26  ;;  %v29_v8 = vsel %vm6_vm0, %v223_v7, %v222_v6  ;;  %v226_v9 = vld [vmem:[%s417_s0 + $0xc] ss:$16 sm:%s47_s25]   ;;  %s59_s3 = smov 3  ;;  %s62_s4 = smov 12  ;;  %vm92_vm8 = vcmask 654912   ;;  %vm104_vm9 = vcmask 589312  }
   0x6   :  { %v227_v10 = vld [vmem:[%s417_s0 + $0xc] ss:$16 sm:%s50_s29]   ;;  %s270_s5 = smov 112   ;;  %v228_v12 = vld [vmem:[%s417_s0 + $0xb] ss:$16 sm:%s59_s3]   ;;  %s71_s8 = smov 3 }
   0x7   :  { %v53_v11 = vsel %vm6_vm0, %v227_v10, %v226_v9  ;;  %v229_v13 = vld [vmem:[%s417_s0 + $0xb] ss:$16 sm:%s62_s4]   ;;  %v230_v14 = vld [vmem:[%s417_s0 + $0xa] ss:$16 sm:%s71_s8]   ;;  %s74_s13 = smov 12  ;;  %s271_s14 = smov 96  }
   0x8   :  { %30 = vrot.lane.b32.xlu0 %v29_v8, %s270_s5  ;;  %v65_v15 = vsel %vm6_vm0, %v229_v13, %v228_v12  ;;  %v231_v16 = vld [vmem:[%s417_s0 + $0xa] ss:$16 sm:%s74_s13]   ;;  %s83_s17 = smov 3  ;;  %s86_s18 = smov 12  ;;  %vm116_vm10 = vcmask 523712   ;;  %vm128_vm11 = vcmask 458112  }
   0x9   :  { %54 = vrot.lane.b32.xlu1 %v53_v11, %s271_s14  ;;  %v77_v17 = vsel %vm6_vm0, %v231_v16, %v230_v14  ;;  %v232_v18 = vld [vmem:[%s417_s0 + $0x9] ss:$16 sm:%s83_s17]   ;;  %s95_s23 = smov 3  ;;  %s272_s24 = smov 88   ;;  %vm140_vm12 = vcmask 392512   ;;  %vm152_vm13 = vcmask 326912  }
   0xa   :  { %v233_v19 = vld [vmem:[%s417_s0 + $0x9] ss:$16 sm:%s86_s18]   ;;  %v234_v20 = vld [vmem:[%s417_s0 + $0x8] ss:$16 sm:%s95_s23]   ;;  %s98_s27 = smov 12  ;;  %s107_s30 = smov 3 }
   0xb   :  { %v89_v21 = vsel %vm6_vm0, %v233_v19, %v232_v18  ;;  %v235_v22 = vld [vmem:[%s417_s0 + $0x8] ss:$16 sm:%s98_s27]   ;;  %s110_s2 = smov 12  ;;  %s273_s3 = smov 80   ;;  %v236_v23 = vld [vmem:[%s417_s0 + $0x7] ss:$16 sm:%s107_s30]  }
   0xc   :  { %66 = vrot.lane.b32.xlu0 %v65_v15, %s272_s24  ;;  %s119_s6 = smov 3  ;;  %v101_v24 = vsel %vm6_vm0, %v235_v22, %v234_v20  ;;  %v237_v25 = vld [vmem:[%s417_s0 + $0x7] ss:$16 sm:%s110_s2]   ;;  %s122_s11 = smov 12  ;;  %vm164_vm14 = vcmask 261312   ;;  %vm176_vm15 = vcmask 195712  }
   0xd   :  { %78 = vrot.lane.b32.xlu1 %v77_v17, %s273_s3  ;;  %v238_v26 = vld [vmem:[%s417_s0 + $0x6] ss:$16 sm:%s119_s6]   ;;  %s274_s12 = smov 72   ;;  %s131_s15 = smov 3  ;;  %v113_v28 = vsel %vm6_vm0, %v237_v25, %v236_v23 }
   0xe   :  { %v239_v27 = vld [vmem:[%s417_s0 + $0x6] ss:$16 sm:%s122_s11]   ;;  %s134_s16 = smov 12  ;;  %v240_v29 = vld [vmem:[%s417_s0 + $0x5] ss:$16 sm:%s131_s15]   ;;  %s143_s19 = smov 3 }
   0xf   :  { %s275_s20 = smov 64   ;;  %v241_v30 = vld [vmem:[%s417_s0 + $0x5] ss:$16 sm:%s134_s16]   ;;  %s146_s23 = smov 12  ;;  %v125_v31 = vsel %vm6_vm0, %v239_v27, %v238_v26  ;;  %v242_v32 = vld [vmem:[%s417_s0 + $0x4] ss:$16 sm:%s143_s19]  }
  0x10   :  { %90 = vrot.lane.b32.xlu0 %v89_v21, %s274_s12  ;;  %s155_s26 = smov 3  ;;  %s158_s27 = smov 12  ;;  %v243_v33 = vld [vmem:[%s417_s0 + $0x4] ss:$16 sm:%s146_s23]   ;;  %v137_v34 = vsel %vm6_vm0, %v241_v30, %v240_v29 }
  0x11   :  { %102 = vrot.lane.b32.xlu1 %v101_v24, %s275_s20  ;;  %s276_s28 = smov 56   ;;  %s167_s2 = smov 3  ;;  %v244_v35 = vld [vmem:[%s417_s0 + $0x3] ss:$16 sm:%s155_s26]   ;;  %v149_v37 = vsel %vm6_vm0, %v243_v33, %v242_v32 }
  0x12   :  { %s170_s5 = smov 12  ;;  %s277_s6 = smov 48   ;;  %v245_v36 = vld [vmem:[%s417_s0 + $0x3] ss:$16 sm:%s158_s27]   ;;  %v246_v38 = vld [vmem:[%s417_s0 + $0x2] ss:$16 sm:%s167_s2]  }
  0x13   :  { %s179_s9 = smov 3  ;;  %v247_v39 = vld [vmem:[%s417_s0 + $0x2] ss:$16 sm:%s170_s5]   ;;  %s182_s14 = smov 12  ;;  %v161_v41 = vsel %vm6_vm0, %v245_v36, %v244_v35 }
  0x14   :  { %114 = vrot.lane.b32.xlu0 %v113_v28, %s276_s28  ;;  %s2_s15 = smov 3  ;;  %s278_s16 = smov 40   ;;  %v248_v42 = vld [vmem:[%s417_s0 + $0x1] ss:$16 sm:%s179_s9]   ;;  %v173_v46 = vsel %vm6_vm0, %v247_v39, %v246_v38 }
  0x15   :  { %126 = vrot.lane.b32.xlu1 %v125_v31, %s277_s6  ;;  %v3_v40 = vld [vmem:[%s417_s0] ss:$16 sm:%s2_s15]   ;;  %s4_s19 = smov 12  ;;  %s279_s24 = smov 32  }
  0x16   :  { %v5_v43 = vld [vmem:[%s417_s0] ss:$16 sm:%s4_s19]   ;;  %v249_v44 = vld [vmem:[%s417_s0 + $0x1] ss:$16 sm:%s182_s14]   ;;  %s280_s0 = smov 24   ;;  %s281_s27 = smov 16  }
  0x17   :  { %v7_v45 = vsel %vm6_vm0, %v5_v43, %v3_v40  ;;  %v185_v47 = vsel %vm6_vm0, %v249_v44, %v248_v42  ;;  %s282_s28 = smov 8   ;;  %vm188_vm0 = vcmask 130112  }
  0x18   :  { %138 = vrot.lane.b32.xlu0 %v137_v34, %s278_s16  ;;  %9 = vst.msk [vmem:[#allocation0] ss:$8 sm:$0xf] %vm8_vm1, %v7_v45  }
  0x19   :  { %150 = vrot.lane.b32.xlu1 %v149_v37, %s279_s24 }
  0x1c   :  { %162 = vrot.lane.b32.xlu0 %v161_v41, %s280_s0 }
  0x1d   :  { %174 = vrot.lane.b32.xlu1 %v173_v46, %s281_s27 }
  0x20   :  { %186 = vrot.lane.b32.xlu0 %v185_v47, %s282_s28 }
  0x76   :  { %v19_v48 = vpop.permute.xlu0 %18  }
  0x77   :  { %21 = vst.msk [vmem:[#allocation0] ss:$8 sm:$0xf] %vm20_vm2, %v19_v48   ;;  %v43_v49 = vpop.permute.xlu1 %42  }
  0x7a   :  { %v31_v50 = vpop.permute.xlu0 %30  }
  0x7b   :  { %33 = vst.msk [vmem:[#allocation0] ss:$8 sm:$0xf] %vm32_vm3, %v31_v50   ;;  %v55_v51 = vpop.permute.xlu1 %54  }
  0x7c   :  { %45 = vst.msk [vmem:[#allocation0] ss:$8 sm:$0xf] %vm44_vm4, %v43_v49  }
  0x7d   :  { %57 = vst.msk [vmem:[#allocation0] ss:$8 sm:$0xf] %vm56_vm5, %v55_v51  }
  0x7e   :  { %v67_v52 = vpop.permute.xlu0 %66  }
  0x7f   :  { %69 = vst.msk [vmem:[#allocation0] ss:$8 sm:$0xf] %vm68_vm6, %v67_v52   ;;  %v79_v53 = vpop.permute.xlu1 %78  }
  0x80   :  { %81 = vst.msk [vmem:[#allocation0] ss:$8 sm:$0xf] %vm80_vm7, %v79_v53  }
  0x82   :  { %v91_v54 = vpop.permute.xlu0 %90  }
  0x83   :  { %93 = vst.msk [vmem:[#allocation0] ss:$8 sm:$0xf] %vm92_vm8, %v91_v54   ;;  %v103_v55 = vpop.permute.xlu1 %102  }
  0x84   :  { %105 = vst.msk [vmem:[#allocation0] ss:$8 sm:$0xf] %vm104_vm9, %v103_v55  }
  0x86   :  { %v115_v56 = vpop.permute.xlu0 %114  }
  0x87   :  { %117 = vst.msk [vmem:[#allocation0] ss:$8 sm:$0xf] %vm116_vm10, %v115_v56   ;;  %v127_v57 = vpop.permute.xlu1 %126  }
  0x88   :  { %129 = vst.msk [vmem:[#allocation0] ss:$8 sm:$0xf] %vm128_vm11, %v127_v57  }
  0x8a   :  { %v139_v58 = vpop.permute.xlu0 %138  }
  0x8b   :  { %141 = vst.msk [vmem:[#allocation0] ss:$8 sm:$0xf] %vm140_vm12, %v139_v58   ;;  %v151_v59 = vpop.permute.xlu1 %150  }
  0x8c   :  { %153 = vst.msk [vmem:[#allocation0] ss:$8 sm:$0xf] %vm152_vm13, %v151_v59  }
  0x8e   :  { %v163_v60 = vpop.permute.xlu0 %162  }
  0x8f   :  { %165 = vst.msk [vmem:[#allocation0] ss:$8 sm:$0xf] %vm164_vm14, %v163_v60   ;;  %v175_v61 = vpop.permute.xlu1 %174  }
  0x90   :  { %177 = vst.msk [vmem:[#allocation0] ss:$8 sm:$0xf] %vm176_vm15, %v175_v61  }
  0x92   :  { %v187_v62 = vpop.permute.xlu0 %186  }
  0x93   :  { %189 = vst.msk [vmem:[#allocation0] ss:$8 sm:$0xf] %vm188_vm0, %v187_v62  }
  0x9a   :  { %v194_v63 = vld [vmem:[#allocation0] sm:$0x1]  ;;  %v199_v0 = vld [vmem:[#allocation0 + $0x8] sm:$0x1]  ;;  %v205_v1 = vld [vmem:[#allocation0 + $0x10] sm:$0x1] }
  0x9b   :  { %197 = vst [vmem:[%s418_s1] sm:$0x1] %v194_v63  ;;  %250 = vst [vmem:[%s418_s1 + $0x1] sm:$0x1] %v199_v0  ;;  %v212_v2 = vld [vmem:[#allocation0 + $0x18] sm:$0x1] }
  0x9c   :  { %251 = vst [vmem:[%s418_s1 + $0x2] sm:$0x1] %v205_v1  ;;  %252 = vst [vmem:[%s418_s1 + $0x3] sm:$0x1] %v212_v2 }

// kernel: basic_block_forward.6
= control target key start
LH: loop header
LB: loop body
LE: loop exit
PB: predicated region body
PF: predicated region fallthrough
CT: control target
= control target key end

     0   :  { %s718_s15 = smov 0   ;;  %s720_s16 = smov 0   ;;  %s807_s0 = inlined_call_operand.vmem [shape: f32[2,9,9,16], index: 0, kind: input, shape index: {}]   ;;  %s808_s1 = inlined_call_operand.vmem [shape: f32[1,16,8], index: 1, kind: input, shape index: {}]   ;;  %s809_s2 = inlined_call_operand.vmem [shape: f32[2,2,32,8], index: 2, kind: output, shape index: {0}]   ;;  %s810_s3 = inlined_call_operand.vmem [shape: f32[2,2,1,8], index: 3, kind: output, shape index: {1}]   ;;  %s811_s4 = inlined_call_operand.vmem [shape: f32[2,2,1,8], index: 4, kind: output, shape index: {2}]  }
   0x1   :  { %s722_s17 = smov 0   ;;  %s724_s18 = smov 0  }
   0x2   :  { %s726_s19 = smov 0  }
   0x3 LB: > { %s24_s20 = sadd.s32 1, %s683_s17  ;;  %s27_s21 = sadd.s32 1, %s687_s18  ;;  %s691_s19 = sphi %s726_s19, %s15_s19   ;;  %s687_s18 = sphi %s724_s18, %s815_s18   ;;  %s683_s17 = sphi %s722_s17, %s814_s17   ;;  %s679_s16 = sphi %s720_s16, %s813_s16   ;;  %s675_s15 = sphi %s718_s15, %s812_s15  }
   0x4   : > { %p25_p0 = scmp.ge.s32.totalorder %s24_s20, 2  ;;  %p576_p1 = scmp.ge.s32.totalorder %s691_s19, 1 }
   0x5   : > { %p185_p2 = scmp.lt.s32.totalorder %s691_s19, 5 }
   0x6   : > { %s817_s20 = smov (%p25_p0, %s24_s20), 0  ;;  %s819_s21 = smov (!%p25_p0, %s27_s21), %s687_s18 }
   0x7   : > { %p186_p3 = pnand %p576_p1, %p185_p2  ;;  %p29_p4 = scmp.ge.s32.totalorder %s819_s21, 2 }
   0x8   : > { %p229_p5 = scmp.lt.s32.totalorder (!%p186_p3), %s679_s16, 1  ;;  %s591_s27 = sshll.u32 (!%p186_p3), %s675_s15, 6 }
   0x9   : > { %s821_s21 = smov (%p29_p4, %s819_s21), 0  ;;  %189 = sbr.rel (%p186_p3) target bundleno = 238 (0xee), region = 28 }
   0xa   : > { %p236_p6 = scmp.lt.s32.totalorder (!%p186_p3), %s675_s15, 1 }
   0xe   : > { %v265_v0 = vld [vmem:[%s808_s1 + $0x8] sm:$0xff]  ;;  %v264_v1 = vld [vmem:[%s808_s1] sm:$0xff]  ;;  %s823_s16 = smov (!%p229_p5, %s679_s16), 1  ;;  %vm266_vm0 = vcmask 130048   ;;  %s825_s15 = smov (!%p236_p6, %s675_s15), 1  ;;  %vm364_vm1 = vcmask 64512  }
   0xf   : > { %598 = vmatprep.subr.mxu0 %v265_v0  ;;  %608 = vmatprep.subr.mxu1 %v265_v0  ;;  %s612_s26 = smul.u32 144, %s823_s16  ;;  %s578_s6 = sshll.u32 %s825_s15, 2  ;;  %vm382_vm2 = vcmask 57344  }
  0x10   : > { %599 = vmatpush3.msra.mxu0 %v265_v0  ;;  %610 = vmatpush3.msra.mxu1 %v265_v0  ;;  %s579_s7 = sshll.u32 %s823_s16, 3  ;;  %s581_s13 = sshll.u32 %s823_s16, 1 }
  0x11   : > { %600 = vmatprep.subr.mxu0 %v264_v1  ;;  %609 = vmatprep.subr.mxu1 %v264_v1  ;;  %s233_s30 = scalar_lea.vmem %s807_s0, %s612_s26  ;;  %s240_s8 = sadd.s32 %s579_s7, %s578_s6 }
  0x12   : > { %601 = vmatpush3.msra.mxu0 %v264_v1  ;;  %611 = vmatpush3.msra.mxu1 %v264_v1  ;;  %s259_s5 = scalar_lea.vmem %s233_s30, %s591_s27  ;;  %s580_s9 = sshll.u32 %s240_s8, 3 }
  0x13   : > { %v260_v2 = vld [vmem:[%s259_s5] sm:$0xff]  ;;  %v261_v4 = vld [vmem:[%s259_s5 + $0x10] sm:$0xff]  ;;  %s242_s12 = scalar_lea.vmem %s809_s2, %s580_s9  ;;  %s248_s14 = sadd.s32 %s581_s13, %s825_s15 }
  0x14   : > { %v262_v3 = vld [vmem:[%s259_s5 + $0x20] sm:$0xff]  ;;  %602 = vmatprep.mubr.msk.f32.mxu0 %vm266_vm0, %v260_v2  ;;  %v263_v5 = vld [vmem:[%s259_s5 + $0x30] sm:$0xff]  ;;  %s249_s24 = scalar_lea.vmem %s810_s3, %s248_s14  ;;  %s256_s27 = scalar_lea.vmem %s811_s4, %s248_s14 }
  0x15   : > { %605 = vmatprep.mubr.msk.f32.mxu1 %vm266_vm0, %v262_v3  ;;  %603 = vmatmul.mubr.msk.f32.vlgmr.msra.gmra.mxu0 %vm266_vm0, %v261_v4 }
  0x16   : > { %606 = vmatmul.mubr.msk.f32.vlgmr.msra.gmra.mxu1 %vm266_vm0, %v263_v5 }
  0xd5   : > { %v604_v6 = vpop.f32.mrf.mxu0 }
  0xd6   : > { %v607_v7 = vpop.f32.mrf.mxu1  ;;  %366 = vst.msk [vmem:[%s242_s12 + $0x8] sm:$0xff] %vm364_vm1, %v604_v6  ;;  %v385_v8 = vmul.f32 %v604_v6, %v604_v6  ;;  %v370_v11 = vsel %vm364_vm1, %v604_v6, 0.0 }
  0xd7   : > { %368 = vst.msk [vmem:[%s242_s12 + $0x18] sm:$0xff] %vm364_vm1, %v607_v7  ;;  %v345_v9 = vpop.f32.mrf.mxu0  ;;  %v387_v17 = vmul.f32 %v607_v7, %v607_v7  ;;  %v374_v22 = vsel %vm364_vm1, %v607_v7, 0.0 }
  0xd8   : > { %v355_v10 = vpop.f32.mrf.mxu1  ;;  %365 = vst.msk [vmem:[%s242_s12] sm:$0xff] %vm364_vm1, %v345_v9  ;;  %v369_v12 = vsel %vm364_vm1, %v345_v9, 0.0  ;;  %v384_v13 = vmul.f32 %v345_v9, %v345_v9  ;;  %v389_v16 = vsel %vm364_vm1, %v385_v8, 0.0 }
  0xd9   : > { %367 = vst.msk [vmem:[%s242_s12 + $0x10] sm:$0xff] %vm364_vm1, %v355_v10  ;;  %v371_v14 = vadd.f32 %v370_v11, %v369_v12  ;;  %v386_v15 = vmul.f32 %v355_v10, %v355_v10  ;;  %v372_v19 = vsel %vm364_vm1, %v355_v10, 0.0  ;;  %v393_v26 = vsel %vm364_vm1, %v387_v17, 0.0 }
  0xda   : > { %v388_v18 = vsel %vm364_vm1, %v384_v13, 0.0 }
  0xdb   : > { %v390_v20 = vadd.f32 %v389_v16, %v388_v18  ;;  %v373_v21 = vadd.f32 %v372_v19, %v371_v14  ;;  %v391_v23 = vsel %vm364_vm1, %v386_v15, 0.0 }
  0xdd   : > { %v375_v24 = vadd.f32 %v374_v22, %v373_v21  ;;  %v392_v25 = vadd.f32 %v391_v23, %v390_v20 }
  0xdf   : > { %v376_v27 = vrot.slane %v375_v24, 4  ;;  %v394_v28 = vadd.f32 %v393_v26, %v392_v25 }
  0xe1   : > { %v377_v29 = vadd.f32 %v376_v27, %v375_v24  ;;  %v395_v30 = vrot.slane %v394_v28, 4 }
  0xe3   : > { %v378_v31 = vrot.slane %v377_v29, 2  ;;  %v396_v32 = vadd.f32 %v395_v30, %v394_v28 }
  0xe5   : > { %v379_v33 = vadd.f32 %v378_v31, %v377_v29  ;;  %v397_v34 = vrot.slane %v396_v32, 2 }
  0xe7   : > { %v380_v35 = vrot.slane %v379_v33, 1  ;;  %v398_v36 = vadd.f32 %v397_v34, %v396_v32 }
  0xe9   : > { %v381_v37 = vadd.f32 %v380_v35, %v379_v33  ;;  %v399_v38 = vrot.slane %v398_v36, 1 }
  0xeb   : > { %383 = vst.msk [vmem:[%s249_s24] sm:$0x1] %vm382_vm2, %v381_v37  ;;  %v400_v39 = vadd.f32 %v399_v38, %v398_v36 }
  0xed   : > { %401 = vst.msk [vmem:[%s256_s27] sm:$0x1] %vm382_vm2, %v400_v39 }
  0xee PF: > { %s15_s19 = sadd.s32 1, %s691_s19   ;;  %s812_s15 = smov %s683_s17 }
  0xef   : > { %p12_p7 = scmp.ge.s32.totalorder %s15_s19, 6   ;;  %s813_s16 = smov %s687_s18 }
  0xf0   : > { %s814_s17 = smov %s817_s20  ;;  %s815_s18 = smov %s821_s21 }
  0xf1   :  { %14 = sbr.rel (!%p12_p7) target bundleno = 3 (0x3), region = 83 }

// kernel: basic_block_forward.4
= control target key start
LH: loop header
LB: loop body
LE: loop exit
PB: predicated region body
PF: predicated region fallthrough
CT: control target
= control target key end

     0   :  { %s1118_s15 = smov 0   ;;  %s1120_s16 = smov 0   ;;  %s1253_s0 = inlined_call_operand.vmem [shape: f32[2,9,9,16], index: 0, kind: input, shape index: {}]   ;;  %s1254_s1 = inlined_call_operand.vmem [shape: f32[4,16,8], index: 1, kind: input, shape index: {}]   ;;  %s1255_s2 = inlined_call_operand.vmem [shape: f32[2,2,32,8], index: 2, kind: output, shape index: {0}]   ;;  %s1256_s3 = inlined_call_operand.vmem [shape: f32[2,2,1,8], index: 3, kind: output, shape index: {1}]   ;;  %s1257_s4 = inlined_call_operand.vmem [shape: f32[2,2,1,8], index: 4, kind: output, shape index: {2}]  }
   0x1   :  { %s1122_s17 = smov 0   ;;  %s1124_s18 = smov 0  }
   0x2   :  { %s1126_s19 = smov 0  }
   0x3 LB: > { %s24_s20 = sadd.s32 1, %s1083_s17  ;;  %s27_s21 = sadd.s32 1, %s1087_s18  ;;  %s1091_s19 = sphi %s1126_s19, %s15_s19   ;;  %s1087_s18 = sphi %s1124_s18, %s1261_s18   ;;  %s1083_s17 = sphi %s1122_s17, %s1260_s17   ;;  %s1079_s16 = sphi %s1120_s16, %s1259_s16   ;;  %s1075_s15 = sphi %s1118_s15, %s1258_s15  }
   0x4   : > { %p25_p0 = scmp.ge.s32.totalorder %s24_s20, 2  ;;  %p903_p1 = scmp.ge.s32.totalorder %s1091_s19, 1 }
   0x5   : > { %p185_p2 = scmp.lt.s32.totalorder %s1091_s19, 5 }
   0x6   : > { %s1263_s20 = smov (%p25_p0, %s24_s20), 0  ;;  %s1265_s21 = smov (!%p25_p0, %s27_s21), %s1087_s18 }
   0x7   : > { %p186_p3 = pnand %p903_p1, %p185_p2  ;;  %p29_p4 = scmp.ge.s32.totalorder %s1265_s21, 2 }
   0x8   : > { %p229_p5 = scmp.lt.s32.totalorder (!%p186_p3), %s1079_s16, 1  ;;  %s946_s9 = sshll.u32 (!%p186_p3), %s1075_s15, 6 }
   0x9   : > { %s1267_s21 = smov (%p29_p4, %s1265_s21), 0  ;;  %189 = sbr.rel (%p186_p3) target bundleno = 252 (0xfc), region = 28 }
   0xa   : > { %p236_p6 = scmp.lt.s32.totalorder (!%p186_p3), %s1075_s15, 1 }
   0xe   : > { %v913_v0 = vld [vmem:[%s1254_s1 + $0x18] sm:$0xff]  ;;  %v265_v1 = vld [vmem:[%s1254_s1 + $0x8] sm:$0xff]  ;;  %v912_v2 = vld [vmem:[%s1254_s1 + $0x10] sm:$0xff]  ;;  %s1269_s16 = smov (!%p229_p5, %s1079_s16), 1  ;;  %vm273_vm0 = vcmask 130048   ;;  %s1271_s15 = smov (!%p236_p6, %s1075_s15), 1 }
   0xf   : > { %972 = vmatprep.subr.mxu0 %v913_v0  ;;  %982 = vmatprep.subr.mxu1 %v265_v1  ;;  %v264_v3 = vld [vmem:[%s1254_s1] sm:$0xff]  ;;  %v929_v4 = vld [vmem:[%s1254_s1 + $0x28] sm:$0xff]  ;;  %v939_v5 = vld [vmem:[%s1254_s1 + $0x38] sm:$0xff]  ;;  %s1012_s8 = smul.u32 144, %s1269_s16  ;;  %s905_s25 = sshll.u32 %s1271_s15, 2  ;;  %vm687_vm1 = vcmask 64512  }
  0x10   : > { %973 = vmatpush3.msra.mxu0 %v913_v0  ;;  %983 = vmatpush3.msra.mxu1 %v265_v1  ;;  %v928_v12 = vld [vmem:[%s1254_s1 + $0x20] sm:$0xff]  ;;  %v938_v13 = vld [vmem:[%s1254_s1 + $0x30] sm:$0xff]  ;;  %s906_s26 = sshll.u32 %s1269_s16, 3  ;;  %s908_s6 = sshll.u32 %s1269_s16, 1  ;;  %vm705_vm2 = vcmask 57344  }
  0x11   : > { %974 = vmatprep.subr.mxu0 %v912_v2  ;;  %984 = vmatprep.subr.mxu1 %v264_v3  ;;  %s233_s12 = scalar_lea.vmem %s1253_s0, %s1012_s8  ;;  %s240_s27 = sadd.s32 %s906_s26, %s905_s25 }
  0x12   : > { %975 = vmatpush3.msra.mxu0 %v912_v2  ;;  %985 = vmatpush3.msra.mxu1 %v264_v3  ;;  %s1175_s13 = scalar_lea.vmem %s233_s12, %s946_s9  ;;  %s907_s28 = sshll.u32 %s240_s27, 3 }
  0x13   : > { %992 = vmatprep.subr.mxu0 %v929_v4  ;;  %1002 = vmatprep.subr.mxu1 %v939_v5  ;;  %v266_v6 = vld [vmem:[%s1175_s13 + $0x1] sm:$0xff]  ;;  %v267_v8 = vld [vmem:[%s1175_s13 + $0x11] sm:$0xff]  ;;  %s242_s5 = scalar_lea.vmem %s1255_s2, %s907_s28  ;;  %s248_s7 = sadd.s32 %s908_s6, %s1271_s15 }
  0x14   : > { %v260_v7 = vld [vmem:[%s1175_s13] sm:$0xff]  ;;  %976 = vmatprep.mubr.msk.f32.mxu0 %vm273_vm0, %v266_v6  ;;  %v261_v9 = vld [vmem:[%s1175_s13 + $0x10] sm:$0xff]  ;;  %s249_s10 = scalar_lea.vmem %s1256_s3, %s248_s7 }
  0x15   : > { %986 = vmatprep.mubr.msk.f32.mxu1 %vm273_vm0, %v260_v7  ;;  %v268_v10 = vld [vmem:[%s1175_s13 + $0x21] sm:$0xff]  ;;  %977 = vmatmul.mubr.msk.f32.vlgmr.msra.gmra.mxu0 %vm273_vm0, %v267_v8  ;;  %v269_v14 = vld [vmem:[%s1175_s13 + $0x31] sm:$0xff] }
  0x16   : > { %v262_v11 = vld [vmem:[%s1175_s13 + $0x20] sm:$0xff]  ;;  %987 = vmatmul.mubr.msk.f32.vlgmr.msra.gmra.mxu1 %vm273_vm0, %v261_v9  ;;  %993 = vmatpush3.msra.mxu0 %v929_v4  ;;  %v263_v15 = vld [vmem:[%s1175_s13 + $0x30] sm:$0xff] }
  0x17   : > { %1003 = vmatpush3.msra.mxu1 %v939_v5  ;;  %979 = vmatprep.mubr.msk.f32.mxu0 %vm273_vm0, %v268_v10  ;;  %v927_v16 = vld [vmem:[%s1175_s13 + $0x40] sm:$0xff] }
  0x18   : > { %989 = vmatprep.mubr.msk.f32.mxu1 %vm273_vm0, %v262_v11  ;;  %994 = vmatprep.subr.mxu0 %v928_v12  ;;  %v937_v17 = vld [vmem:[%s1175_s13 + $0x41] sm:$0xff]  ;;  %s256_s13 = scalar_lea.vmem %s1257_s4, %s248_s7 }
  0x19   : > { %1004 = vmatprep.subr.mxu1 %v938_v13  ;;  %980 = vmatmul.mubr.msk.f32.gmra.mxu0 %vm273_vm0, %v269_v14 }
  0x1a   : > { %990 = vmatmul.mubr.msk.f32.gmra.mxu1 %vm273_vm0, %v263_v15  ;;  %995 = vmatpush3.msra.mxu0 %v928_v12 }
  0x1b   : > { %1005 = vmatpush3.msra.mxu1 %v938_v13  ;;  %996 = vmatprep.mubr.msk.f32.mxu0 %vm273_vm0, %v261_v9 }
  0x1c   : > { %1006 = vmatprep.mubr.msk.f32.mxu1 %vm273_vm0, %v267_v8 }
  0x1d   : > { %997 = vmatmul.mubr.msk.f32.vlgmr.msra.gmra.mxu0 %vm273_vm0, %v262_v11 }
  0x1e   : > { %1007 = vmatmul.mubr.msk.f32.vlgmr.msra.gmra.mxu1 %vm273_vm0, %v268_v10  ;;  %999 = vmatprep.mubr.msk.f32.mxu0 %vm273_vm0, %v263_v15 }
  0x1f   : > { %1009 = vmatprep.mubr.msk.f32.mxu1 %vm273_vm0, %v269_v14 }
  0x21   : > { %1000 = vmatmul.mubr.msk.f32.gmra.mxu0 %vm273_vm0, %v927_v16 }
  0x22   : > { %1010 = vmatmul.mubr.msk.f32.gmra.mxu1 %vm273_vm0, %v937_v17 }
  0xd5   : > { %v978_v18 = vpop.f32.mrf.mxu0 }
  0xd6   : > { %v988_v19 = vpop.f32.mrf.mxu1 }
  0xd7   : > { %v352_v20 = vpop.f32.mrf.mxu0  ;;  %v455_v26 = vadd.f32 %v988_v19, %v978_v18 }
  0xd8   : > { %v449_v21 = vpop.f32.mrf.mxu1 }
  0xd9   : > { %v981_v22 = vpop.f32.mrf.mxu0  ;;  %v450_v29 = vadd.f32 %v449_v21, %v352_v20 }
  0xda   : > { %v991_v23 = vpop.f32.mrf.mxu1 }
  0xdb   : > { %v362_v24 = vpop.f32.mrf.mxu0  ;;  %v465_v33 = vadd.f32 %v991_v23, %v981_v22 }
  0xdc   : > { %v459_v25 = vpop.f32.mrf.mxu1 }
  0xdd   : > { %v998_v27 = vpop.f32.mrf.mxu0  ;;  %v460_v40 = vadd.f32 %v459_v25, %v362_v24 }
  0xde   : > { %v1008_v28 = vpop.f32.mrf.mxu1  ;;  %v576_v30 = vadd.f32 %v998_v27, %v455_v26 }
  0xdf   : > { %v556_v31 = vpop.f32.mrf.mxu0 }
  0xe0   : > { %v664_v32 = vpop.f32.mrf.mxu1  ;;  %v684_v34 = vadd.f32 %v1008_v28, %v576_v30  ;;  %v575_v35 = vadd.f32 %v556_v31, %v450_v29 }
  0xe1   : > { %v1001_v36 = vpop.f32.mrf.mxu0 }
  0xe2   : > { %689 = vst.msk [vmem:[%s242_s5 + $0x8] sm:$0xff] %vm687_vm1, %v684_v34  ;;  %v683_v37 = vadd.f32 %v664_v32, %v575_v35  ;;  %v578_v38 = vadd.f32 %v1001_v36, %v465_v33  ;;  %v1011_v39 = vpop.f32.mrf.mxu1  ;;  %v708_v44 = vmul.f32 %v684_v34, %v684_v34  ;;  %v693_v48 = vsel %vm687_vm1, %v684_v34, 0.0 }
  0xe3   : > { %v566_v41 = vpop.f32.mrf.mxu0 }
  0xe4   : > { %688 = vst.msk [vmem:[%s242_s5] sm:$0xff] %vm687_vm1, %v683_v37  ;;  %v707_v42 = vmul.f32 %v683_v37, %v683_v37  ;;  %v686_v43 = vadd.f32 %v1011_v39, %v578_v38  ;;  %v692_v45 = vsel %vm687_vm1, %v683_v37, 0.0  ;;  %v577_v46 = vadd.f32 %v566_v41, %v460_v40  ;;  %v674_v47 = vpop.f32.mrf.mxu1 }
  0xe5   : > { %v694_v51 = vadd.f32 %v693_v48, %v692_v45  ;;  %v712_v52 = vsel %vm687_vm1, %v708_v44, 0.0 }
  0xe6   : > { %691 = vst.msk [vmem:[%s242_s5 + $0x18] sm:$0xff] %vm687_vm1, %v686_v43  ;;  %v711_v49 = vsel %vm687_vm1, %v707_v42, 0.0  ;;  %v685_v50 = vadd.f32 %v674_v47, %v577_v46  ;;  %v710_v53 = vmul.f32 %v686_v43, %v686_v43  ;;  %v697_v58 = vsel %vm687_vm1, %v686_v43, 0.0 }
  0xe7   : > { %v713_v56 = vadd.f32 %v712_v52, %v711_v49 }
  0xe8   : > { %690 = vst.msk [vmem:[%s242_s5 + $0x10] sm:$0xff] %vm687_vm1, %v685_v50  ;;  %v695_v54 = vsel %vm687_vm1, %v685_v50, 0.0  ;;  %v709_v55 = vmul.f32 %v685_v50, %v685_v50  ;;  %v716_v62 = vsel %vm687_vm1, %v710_v53, 0.0 }
  0xe9   : > { %v696_v57 = vadd.f32 %v695_v54, %v694_v51 }
  0xea   : > { %v714_v59 = vsel %vm687_vm1, %v709_v55, 0.0 }
  0xeb   : > { %v698_v60 = vadd.f32 %v697_v58, %v696_v57  ;;  %v715_v61 = vadd.f32 %v714_v59, %v713_v56 }
  0xed   : > { %v699_v63 = vrot.slane %v698_v60, 4  ;;  %v717_v0 = vadd.f32 %v716_v62, %v715_v61 }
  0xef   : > { %v700_v1 = vadd.f32 %v699_v63, %v698_v60  ;;  %v718_v2 = vrot.slane %v717_v0, 4 }
  0xf1   : > { %v701_v3 = vrot.slane %v700_v1, 2  ;;  %v719_v4 = vadd.f32 %v718_v2, %v717_v0 }
  0xf3   : > { %v702_v5 = vadd.f32 %v701_v3, %v700_v1  ;;  %v720_v6 = vrot.slane %v719_v4, 2 }
  0xf5   : > { %v703_v7 = vrot.slane %v702_v5, 1  ;;  %v721_v8 = vadd.f32 %v720_v6, %v719_v4 }
  0xf7   : > { %v704_v9 = vadd.f32 %v703_v7, %v702_v5  ;;  %v722_v10 = vrot.slane %v721_v8, 1 }
  0xf9   : > { %706 = vst.msk [vmem:[%s249_s10] sm:$0x1] %vm705_vm2, %v704_v9  ;;  %v723_v11 = vadd.f32 %v722_v10, %v721_v8 }
  0xfb   : > { %724 = vst.msk [vmem:[%s256_s13] sm:$0x1] %vm705_vm2, %v723_v11 }
  0xfc PF: > { %s15_s19 = sadd.s32 1, %s1091_s19   ;;  %s1258_s15 = smov %s1083_s17 }
  0xfd   : > { %p12_p7 = scmp.ge.s32.totalorder %s15_s19, 6   ;;  %s1259_s16 = smov %s1087_s18 }
  0xfe   : > { %s1260_s17 = smov %s1263_s20  ;;  %s1261_s18 = smov %s1267_s21 }
  0xff   :  { %14 = sbr.rel (!%p12_p7) target bundleno = 3 (0x3), region = 87 }

// kernel: basic_block_forward.7
= control target key start
LH: loop header
LB: loop body
LE: loop exit
PB: predicated region body
PF: predicated region fallthrough
CT: control target
= control target key end

     0   :  { %v17_v0 = vlaneseq  ;;  %v178_v1 = vmov 1983009808   ;;  %s220_s2 = inlined_call_operand.vmem [shape: f32[4,512], index: 2, kind: input, shape index: {}]   ;;  %s221_s0 = inlined_call_operand.vmem [shape: f32[2,512], index: 0, kind: input, shape index: {}]   ;;  %s222_s1 = inlined_call_operand.vmem [shape: f32[2,512], index: 1, kind: input, shape index: {}]   ;;  %s223_s3 = inlined_call_operand.vmem [shape: f32[2,512], index: 3, kind: output, shape index: {}]  }
   0x1   :  { %v36_v2 = vunpack.c.l.s4 %v178_v1  ;;  %v15_v4 = vld [vmem:[%s220_s2] ss:$4 sm:$0xf]  ;;  %v174_v6 = vld [vmem:[%s220_s2 + $0x1] ss:$4 sm:$0xf] }
   0x2   :  { %v18_v3 = vshrl.u32 %v17_v0, 7  ;;  %v175_v12 = vld [vmem:[%s220_s2 + $0x2] ss:$4 sm:$0xf] }
   0x3   :  { %v37_v5 = vunpack.c.0.s8 %v36_v2  ;;  %v176_v21 = vld [vmem:[%s220_s2 + $0x3] ss:$4 sm:$0xf] }
   0x4   :  { %v19_v7 = vsub.s32 0, %v18_v3  ;;  %v23_v8 = vsub.s32 1, %v18_v3  ;;  %v27_v9 = vsub.s32 2, %v18_v3  ;;  %v31_v10 = vsub.s32 3, %v18_v3  ;;  %v14_v34 = vld [vmem:[%s221_s0] sm:$0xff] }
   0x5   :  { %v40_v11 = vsub.s32 %v37_v5, %v18_v3  ;;  %v90_v47 = vld [vmem:[%s222_s1] sm:$0xff] }
   0x6   :  { %v20_v13 = vrot.slane %v15_v4, %v19_v7  ;;  %v24_v14 = vrot.slane %v15_v4, %v23_v8  ;;  %v28_v15 = vrot.slane %v15_v4, %v27_v9  ;;  %v32_v16 = vrot.slane %v15_v4, %v31_v10 }
   0x7   :  { %v58_v17 = vrot.slane %v174_v6, %v19_v7  ;;  %v62_v18 = vrot.slane %v174_v6, %v23_v8  ;;  %v66_v19 = vrot.slane %v174_v6, %v27_v9  ;;  %v70_v20 = vrot.slane %v174_v6, %v31_v10 }
   0x8   :  { %v33_v22 = vcombine.low %v20_v13, %v24_v14  ;;  %v34_v23 = vcombine.low %v28_v15, %v32_v16  ;;  %v97_v24 = vrot.slane %v175_v12, %v19_v7  ;;  %v101_v25 = vrot.slane %v175_v12, %v23_v8 }
   0x9   :  { %v71_v26 = vcombine.low %v58_v17, %v62_v18  ;;  %v72_v27 = vcombine.low %v66_v19, %v70_v20  ;;  %v105_v28 = vrot.slane %v175_v12, %v27_v9  ;;  %v109_v29 = vrot.slane %v175_v12, %v31_v10 }
   0xa   :  { %v41_v30 = vrot.slane %v33_v22, %v40_v11  ;;  %v48_v31 = vrot.slane %v34_v23, %v40_v11  ;;  %v110_v32 = vcombine.low %v97_v24, %v101_v25  ;;  %v135_v33 = vrot.slane %v176_v21, %v19_v7 }
   0xb   :  { %v79_v35 = vrot.slane %v71_v26, %v40_v11  ;;  %v86_v36 = vrot.slane %v72_v27, %v40_v11  ;;  %v111_v37 = vcombine.low %v105_v28, %v109_v29  ;;  %v139_v38 = vrot.slane %v176_v21, %v23_v8 }
   0xc   :  { %v49_v39 = vcombine.low %v41_v30, %v48_v31  ;;  %v118_v40 = vrot.slane %v110_v32, %v40_v11  ;;  %v143_v41 = vrot.slane %v176_v21, %v27_v9  ;;  %v147_v42 = vrot.slane %v176_v21, %v31_v10 }
   0xd   :  { %v125_v43 = vrot.slane %v111_v37, %v40_v11  ;;  %v148_v44 = vcombine.low %v135_v33, %v139_v38  ;;  %v87_v46 = vcombine.low %v79_v35, %v86_v36 }
   0xe   :  { %v51_v45 = vmul.f32 %v49_v39, %v14_v34  ;;  %v149_v48 = vcombine.low %v143_v41, %v147_v42 }
   0xf   :  { %v126_v49 = vcombine.low %v118_v40, %v125_v43  ;;  %v156_v50 = vrot.slane %v148_v44, %v40_v11 }
  0x10   :  { %v163_v51 = vrot.slane %v149_v48, %v40_v11  ;;  %v89_v53 = vadd.f32 %v87_v46, %v51_v45 }
  0x11   :  { %v128_v52 = vmul.f32 %v126_v49, %v90_v47 }
  0x12   :  { %v164_v54 = vcombine.low %v156_v50, %v163_v51 }
  0x14   :  { %v166_v55 = vadd.f32 %v164_v54, %v128_v52 }
  0x16   :  { %v167_v56 = vadd.f32 %v166_v55, %v89_v53 }
  0x18   :  { %v168_v57 = vmax.f32 %v167_v56, 0.0 }
  0x1a   :  { %169 = vst [vmem:[%s223_s3] sm:$0xff] %v168_v57 }

// kernel: basic_block_forward.5
= control target key start
LH: loop header
LB: loop body
LE: loop exit
PB: predicated region body
PF: predicated region fallthrough
CT: control target
= control target key end

     0   :  { %s1868_s18 = smov 0   ;;  %s1870_s19 = smov 0   ;;  %s2098_s0 = inlined_call_operand.vmem [shape: f32[2,8,8,8], index: 0, kind: input, shape index: {}]   ;;  %s2099_s1 = inlined_call_operand.vmem [shape: f32[9,8,8], index: 1, kind: input, shape index: {}]   ;;  %s2100_s2 = inlined_call_operand.vmem [shape: f32[2,8], index: 2, kind: input, shape index: {}]   ;;  %s2101_s3 = inlined_call_operand.vmem [shape: f32[2,2,32,8], index: 3, kind: output, shape index: {0}]   ;;  %s2102_s4 = inlined_call_operand.vmem [shape: f32[2,2,1,8], index: 4, kind: output, shape index: {1}]   ;;  %s2103_s5 = inlined_call_operand.vmem [shape: f32[2,2,1,8], index: 5, kind: output, shape index: {2}]  }
   0x1   :  { %s1872_s20 = smov 0   ;;  %s1874_s21 = smov 0  }
   0x2   :  { %s1876_s22 = smov 0  }
   0x3 LB: > { %s25_s23 = sadd.s32 1, %s1827_s20  ;;  %s28_s24 = sadd.s32 1, %s1831_s21  ;;  %s1835_s22 = sphi %s1876_s22, %s16_s22   ;;  %s1831_s21 = sphi %s1874_s21, %s2107_s21   ;;  %s1827_s20 = sphi %s1872_s20, %s2106_s20   ;;  %s1823_s19 = sphi %s1870_s19, %s2105_s19   ;;  %s1819_s18 = sphi %s1868_s18, %s2104_s18  }
   0x4   : > { %p26_p0 = scmp.ge.s32.totalorder %s25_s23, 2  ;;  %p1546_p1 = scmp.ge.s32.totalorder %s1835_s22, 1 }
   0x5   : > { %p210_p2 = scmp.lt.s32.totalorder %s1835_s22, 5 }
   0x6   : > { %s2109_s23 = smov (%p26_p0, %s25_s23), 0  ;;  %s2111_s24 = smov (!%p26_p0, %s28_s24), %s1831_s21 }
   0x7   : > { %p211_p3 = pnand %p1546_p1, %p210_p2  ;;  %p30_p4 = scmp.ge.s32.totalorder %s2111_s24, 2 }
   0x8   : > { %p256_p5 = scmp.lt.s32.totalorder (!%p211_p3), %s1823_s19, 1  ;;  %p263_p6 = scmp.lt.s32.totalorder (!%p211_p3), %s1819_s18, 1 }
   0x9   : > { %s2113_s24 = smov (%p30_p4, %s2111_s24), 0  ;;  %214 = sbr.rel (%p211_p3) target bundleno = 301 (0x12d), region = 32 }
   0xa   : > { %p1554_p7 = scmp.ne.s32.totalorder (!%p211_p3), %s1819_s18, 0 }
   0xe   : > { %s2115_s19 = smov (!%p256_p5, %s1823_s19), 1 }
   0xf   : > { %s264_s25 = scalar_select %p263_p6, %s1819_s18, 1 }
  0x10   : > { %s1633_s26 = sshll.u32 %s2115_s19, 6  ;;  %s1550_s27 = sshll.u32 %s2115_s19, 3 }
  0x11   : > { %s1905_s30 = scalar_lea.vmem %s2098_s0, %s1633_s26  ;;  %s1549_s6 = sshll.u32 %s264_s25, 2 }
  0x12   : > { %s267_s7 = sadd.s32 %s1550_s27, %s1549_s6  ;;  %s1552_s8 = sshll.u32 %s2115_s19, 1 }
  0x13   : > { %s1551_s9 = sshll.u32 %s267_s7, 3  ;;  %s1907_s10 = sadd.s32 %s1552_s8, %s264_s25 }
  0x14   : > { %s1912_s13 = scalar_lea.vmem %s2101_s3, %s1551_s9  ;;  %s276_s16 = scalar_lea.vmem %s2102_s4, %s1907_s10 }
  0x15   : > { %s283_s28 = scalar_lea.vmem %s2103_s5, %s1907_s10  ;;  %287 = sbr.rel (%p1554_p7) target bundleno = 41 (0x29), region = 36 }
  0x1a   : > { %vm288_vm0 = vcmask 64512   ;;  %vm290_vm1 = vcmask 58368   ;;  %vm296_vm2 = vcmask 57344   ;;  %v313_v0 = vld [vmem:[%s1905_s30] sm:$0xff]  ;;  %v314_v1 = vld [vmem:[%s1905_s30 + $0x8] sm:$0xff]  ;;  %v1837_v2 = vmov 0.0  }
  0x1b   : > { %289 = vst.msk [vmem:[#allocation2] sm:$0xff] %vm288_vm0, %v1837_v2  ;;  %293 = vst.msk [vmem:[#allocation2 + $0x90] sm:$0xff] %vm288_vm0, %v1837_v2  ;;  %v1555_v3 = vld [vmem:[%s2100_s2] ss:$0 sm:$0xff]  ;;  %v1556_v4 = vld [vmem:[%s2100_s2 + $0x1] ss:$0 sm:$0xff] }
  0x1c   : > { %291 = vst.msk [vmem:[#allocation2 + $0x8] sm:$0x3] %vm290_vm1, %v1837_v2  ;;  %294 = vst.msk [vmem:[#allocation2 + $0x98] sm:$0x3] %vm290_vm1, %v1837_v2  ;;  %v315_v5 = vld [vmem:[%s1905_s30 + $0x10] sm:$0xff]  ;;  %v326_v6 = vmul.f32 %v1555_v3, %v313_v0  ;;  %v327_v7 = vmul.f32 %v1555_v3, %v314_v1  ;;  %v316_v9 = vld [vmem:[%s1905_s30 + $0x18] sm:$0xff] }
  0x1d   : > { %297 = vst.msk [vmem:[#allocation2 + $0x10] sm:$0x1] %vm296_vm2, %v1837_v2  ;;  %298 = vst.msk [vmem:[#allocation2 + $0x20] sm:$0x1] %vm296_vm2, %v1837_v2  ;;  %v328_v8 = vmul.f32 %v1555_v3, %v315_v5  ;;  %v317_v10 = vld [vmem:[%s1905_s30 + $0x20] sm:$0xff]  ;;  %v318_v11 = vld [vmem:[%s1905_s30 + $0x28] sm:$0xff]  ;;  %v329_v12 = vmul.f32 %v1555_v3, %v316_v9 }
  0x1e   : > { %299 = vst.msk [vmem:[#allocation2 + $0x30] sm:$0x1] %vm296_vm2, %v1837_v2  ;;  %300 = vst.msk [vmem:[#allocation2 + $0x40] sm:$0x1] %vm296_vm2, %v1837_v2  ;;  %v330_v13 = vmul.f32 %v1555_v3, %v317_v10  ;;  %v331_v14 = vmul.f32 %v1555_v3, %v318_v11  ;;  %v319_v15 = vld [vmem:[%s1905_s30 + $0x30] sm:$0xff]  ;;  %v320_v16 = vld [vmem:[%s1905_s30 + $0x38] sm:$0xff]  ;;  %v339_v17 = vadd.f32 %v1556_v4, %v326_v6 }
  0x1f   : > { %301 = vst.msk [vmem:[#allocation2 + $0x50] sm:$0x1] %vm296_vm2, %v1837_v2  ;;  %302 = vst.msk [vmem:[#allocation2 + $0x60] sm:$0x1] %vm296_vm2, %v1837_v2  ;;  %v340_v18 = vadd.f32 %v1556_v4, %v327_v7  ;;  %v341_v19 = vadd.f32 %v1556_v4, %v328_v8  ;;  %v332_v20 = vmul.f32 %v1555_v3, %v319_v15 }
  0x20   : > { %303 = vst.msk [vmem:[#allocation2 + $0x70] sm:$0x1] %vm296_vm2, %v1837_v2  ;;  %304 = vst.msk [vmem:[#allocation2 + $0x80] sm:$0x1] %vm296_vm2, %v1837_v2  ;;  %v342_v21 = vadd.f32 %v1556_v4, %v329_v12  ;;  %v343_v22 = vadd.f32 %v1556_v4, %v330_v13  ;;  %v344_v23 = vadd.f32 %v1556_v4, %v331_v14  ;;  %v347_v25 = vmax.f32 %v339_v17, 0.0 }
  0x21   : > { %305 = vst.msk [vmem:[#allocation2 + $0x19] sm:$0x1] %vm296_vm2, %v1837_v2  ;;  %306 = vst.msk [vmem:[#allocation2 + $0x29] sm:$0x1] %vm296_vm2, %v1837_v2  ;;  %v333_v24 = vmul.f32 %v1555_v3, %v320_v16  ;;  %v348_v26 = vmax.f32 %v340_v18, 0.0  ;;  %v349_v27 = vmax.f32 %v341_v19, 0.0  ;;  %v345_v28 = vadd.f32 %v1556_v4, %v332_v20 }
  0x22   : > { %307 = vst.msk [vmem:[#allocation2 + $0x39] sm:$0x1] %vm296_vm2, %v1837_v2  ;;  %308 = vst.msk [vmem:[#allocation2 + $0x49] sm:$0x1] %vm296_vm2, %v1837_v2  ;;  %v350_v29 = vmax.f32 %v342_v21, 0.0  ;;  %v351_v30 = vmax.f32 %v343_v22, 0.0 }
  0x23   : > { %309 = vst.msk [vmem:[#allocation2 + $0x59] sm:$0x1] %vm296_vm2, %v1837_v2  ;;  %310 = vst.msk [vmem:[#allocation2 + $0x69] sm:$0x1] %vm296_vm2, %v1837_v2  ;;  %v352_v31 = vmax.f32 %v344_v23, 0.0  ;;  %v346_v32 = vadd.f32 %v1556_v4, %v333_v24  ;;  %v353_v33 = vmax.f32 %v345_v28, 0.0 }
  0x24   : > { %311 = vst.msk [vmem:[#allocation2 + $0x79] sm:$0x1] %vm296_vm2, %v1837_v2  ;;  %312 = vst.msk [vmem:[#allocation2 + $0x89] sm:$0x1] %vm296_vm2, %v1837_v2 }
  0x25   : > { %355 = vst.msk [vmem:[#allocation2 + $0x11] sm:$0xff] %vm288_vm0, %v347_v25  ;;  %356 = vst.msk [vmem:[#allocation2 + $0x21] sm:$0xff] %vm288_vm0, %v348_v26  ;;  %v354_v34 = vmax.f32 %v346_v32, 0.0 }
  0x26   : > { %357 = vst.msk [vmem:[#allocation2 + $0x31] sm:$0xff] %vm288_vm0, %v349_v27  ;;  %358 = vst.msk [vmem:[#allocation2 + $0x41] sm:$0xff] %vm288_vm0, %v350_v29 }
  0x27   : > { %359 = vst.msk [vmem:[#allocation2 + $0x51] sm:$0xff] %vm288_vm0, %v351_v30  ;;  %360 = vst.msk [vmem:[#allocation2 + $0x61] sm:$0xff] %vm288_vm0, %v352_v31 }
  0x28   : > { %361 = vst.msk [vmem:[#allocation2 + $0x71] sm:$0xff] %vm288_vm0, %v353_v33  ;;  %362 = vst.msk [vmem:[#allocation2 + $0x81] sm:$0xff] %vm288_vm0, %v354_v34 }
  0x29 PF: > { %v1559_v35 = vld [vmem:[%s2099_s1 + $0x8] sm:$0xff]  ;;  %s1634_s7 = sshll.u32 %s1819_s18, 6  ;;  %vm377_vm3 = vcmask 64512   ;;  %v370_v36 = vld [vmem:[%s2099_s1] sm:$0xff]  ;;  %v1568_v37 = vld [vmem:[%s2099_s1 + $0x10] sm:$0xff]  ;;  %vm1344_vm4 = vcmask 57344  }
  0x2a   : > { %1754 = vmatprep.subr.mxu1 %v1559_v35  ;;  %1682 = vmatprep.subr.mxu0 %v1559_v35  ;;  %s1973_s14 = scalar_lea.vmem [#allocation2], %s1634_s7  ;;  %v1579_v44 = vld [vmem:[%s2099_s1 + $0x18] sm:$0xff]  ;;  %v1588_v47 = vld [vmem:[%s2099_s1 + $0x20] sm:$0xff]  ;;  %v1597_v51 = vld [vmem:[%s2099_s1 + $0x28] sm:$0xff] }
  0x2b   : > { %1755 = vmatpush3.msra.mxu1 %v1559_v35  ;;  %1683 = vmatpush3.msra.mxu0 %v1559_v35  ;;  %v1608_v53 = vld [vmem:[%s2099_s1 + $0x30] sm:$0xff]  ;;  %v1617_v54 = vld [vmem:[%s2099_s1 + $0x38] sm:$0xff]  ;;  %v1626_v56 = vld [vmem:[%s2099_s1 + $0x40] sm:$0xff] }
  0x2c   : > { %1690 = vmatprep.subr.mxu1 %v370_v36  ;;  %1698 = vmatprep.subr.mxu0 %v1568_v37 }
  0x2f   : > { %v371_v38 = vld [vmem:[%s1973_s14 + $0x1] sm:$0xff]  ;;  %v372_v40 = vld [vmem:[%s1973_s14 + $0x11] sm:$0xff] }
  0x30   : > { %v1977_v39 = vld [vmem:[%s1973_s14 + $0x21] sm:$0xff]  ;;  %1684 = vmatprep.mubr.msk.f32.mxu0 %vm377_vm3, %v371_v38  ;;  %v1984_v41 = vld [vmem:[%s1973_s14 + $0x31] sm:$0xff] }
  0x31   : > { %1687 = vmatprep.mubr.msk.f32.mxu1 %vm377_vm3, %v1977_v39  ;;  %1685 = vmatmul.mubr.msk.f32.vlgmr.msra.gmra.mxu0 %vm377_vm3, %v372_v40  ;;  %v366_v42 = vld [vmem:[%s1973_s14] sm:$0xff]  ;;  %v573_v45 = vld [vmem:[%s1973_s14 + $0x12] sm:$0xff] }
  0x32   : > { %v572_v43 = vld [vmem:[%s1973_s14 + $0x2] sm:$0xff]  ;;  %1688 = vmatmul.mubr.msk.f32.vlgmr.msra.gmra.mxu1 %vm377_vm3, %v1984_v41  ;;  %1699 = vmatpush3.msra.mxu0 %v1568_v37  ;;  %v367_v46 = vld [vmem:[%s1973_s14 + $0x10] sm:$0xff] }
  0x33   : > { %1691 = vmatpush3.msra.mxu1 %v370_v36  ;;  %1692 = vmatprep.mubr.msk.f32.mxu1 %vm377_vm3, %v366_v42  ;;  %v368_v48 = vld [vmem:[%s1973_s14 + $0x20] sm:$0xff]  ;;  %v575_v50 = vld [vmem:[%s1973_s14 + $0x32] sm:$0xff] }
  0x34   : > { %1700 = vmatprep.mubr.msk.f32.mxu0 %vm377_vm3, %v572_v43  ;;  %1706 = vmatprep.subr.mxu1 %v1579_v44  ;;  %v574_v49 = vld [vmem:[%s1973_s14 + $0x22] sm:$0xff]  ;;  %v369_v52 = vld [vmem:[%s1973_s14 + $0x30] sm:$0xff] }
  0x35   : > { %1701 = vmatmul.mubr.msk.f32.vlgmr.msra.gmra.mxu0 %vm377_vm3, %v573_v45  ;;  %1714 = vmatprep.subr.mxu0 %v1588_v47  ;;  %v1587_v55 = vld [vmem:[%s1973_s14 + $0x41] sm:$0xff]  ;;  %v1607_v58 = vld [vmem:[%s1973_s14 + $0x50] sm:$0xff] }
  0x36   : > { %1693 = vmatmul.mubr.msk.f32.vlgmr.msra.gmra.mxu1 %vm377_vm3, %v367_v46  ;;  %1715 = vmatpush3.msra.mxu0 %v1588_v47  ;;  %v1578_v57 = vld [vmem:[%s1973_s14 + $0x40] sm:$0xff]  ;;  %v1625_v60 = vld [vmem:[%s1973_s14 + $0x52] sm:$0xff] }
  0x37   : > { %1707 = vmatpush3.msra.mxu1 %v1579_v44  ;;  %1695 = vmatprep.mubr.msk.f32.mxu1 %vm377_vm3, %v368_v48  ;;  %v1596_v59 = vld [vmem:[%s1973_s14 + $0x42] sm:$0xff]  ;;  %v1616_v61 = vld [vmem:[%s1973_s14 + $0x51] sm:$0xff] }
  0x38   : > { %1703 = vmatprep.mubr.msk.f32.mxu0 %vm377_vm3, %v574_v49  ;;  %1722 = vmatprep.subr.mxu1 %v1597_v51 }
  0x39   : > { %1704 = vmatmul.mubr.msk.f32.gmra.mxu0 %vm377_vm3, %v575_v50  ;;  %1730 = vmatprep.subr.mxu0 %v1608_v53 }
  0x3a   : > { %1696 = vmatmul.mubr.msk.f32.gmra.mxu1 %vm377_vm3, %v369_v52  ;;  %1716 = vmatprep.mubr.msk.f32.mxu0 %vm377_vm3, %v372_v40 }
  0x3b   : > { %1708 = vmatprep.mubr.msk.f32.mxu1 %vm377_vm3, %v367_v46 }
  0x3d   : > { %1717 = vmatmul.mubr.msk.f32.vlgmr.msra.gmra.mxu0 %vm377_vm3, %v1977_v39 }
  0x3e   : > { %1709 = vmatmul.mubr.msk.f32.vlgmr.msra.gmra.mxu1 %vm377_vm3, %v368_v48  ;;  %1731 = vmatpush3.msra.mxu0 %v1608_v53 }
  0x3f   : > { %1723 = vmatpush3.msra.mxu1 %v1597_v51  ;;  %1711 = vmatprep.mubr.msk.f32.mxu1 %vm377_vm3, %v369_v52 }
  0x40   : > { %1719 = vmatprep.mubr.msk.f32.mxu0 %vm377_vm3, %v1984_v41  ;;  %1738 = vmatprep.subr.mxu1 %v1617_v54 }
  0x41   : > { %1720 = vmatmul.mubr.msk.f32.gmra.mxu0 %vm377_vm3, %v1587_v55  ;;  %1746 = vmatprep.subr.mxu0 %v1626_v56 }
  0x42   : > { %1712 = vmatmul.mubr.msk.f32.gmra.mxu1 %vm377_vm3, %v1578_v57  ;;  %1732 = vmatprep.mubr.msk.f32.mxu0 %vm377_vm3, %v368_v48 }
  0x43   : > { %1724 = vmatprep.mubr.msk.f32.mxu1 %vm377_vm3, %v573_v45 }
  0x45   : > { %1733 = vmatmul.mubr.msk.f32.vlgmr.msra.gmra.mxu0 %vm377_vm3, %v369_v52 }
  0x46   : > { %1725 = vmatmul.mubr.msk.f32.vlgmr.msra.gmra.mxu1 %vm377_vm3, %v574_v49  ;;  %1747 = vmatpush3.msra.mxu0 %v1626_v56 }
  0x47   : > { %1739 = vmatpush3.msra.mxu1 %v1617_v54  ;;  %1727 = vmatprep.mubr.msk.f32.mxu1 %vm377_vm3, %v575_v50 }
  0x48   : > { %1735 = vmatprep.mubr.msk.f32.mxu0 %vm377_vm3, %v1578_v57 }
  0x49   : > { %1736 = vmatmul.mubr.msk.f32.gmra.mxu0 %vm377_vm3, %v1607_v58 }
  0x4a   : > { %1728 = vmatmul.mubr.msk.f32.gmra.mxu1 %vm377_vm3, %v1596_v59  ;;  %1748 = vmatprep.mubr.msk.f32.mxu0 %vm377_vm3, %v574_v49 }
  0x4b   : > { %1740 = vmatprep.mubr.msk.f32.mxu1 %vm377_vm3, %v1977_v39 }
  0x4d   : > { %1749 = vmatmul.mubr.msk.f32.vlgmr.msra.gmra.mxu0 %vm377_vm3, %v575_v50 }
  0x4e   : > { %1741 = vmatmul.mubr.msk.f32.vlgmr.msra.gmra.mxu1 %vm377_vm3, %v1984_v41  ;;  %1751 = vmatprep.mubr.msk.f32.mxu0 %vm377_vm3, %v1596_v59 }
  0x4f   : > { %1743 = vmatprep.mubr.msk.f32.mxu1 %vm377_vm3, %v1587_v55 }
  0x51   : > { %1752 = vmatmul.mubr.msk.f32.gmra.mxu0 %vm377_vm3, %v1625_v60 }
  0x52   : > { %1744 = vmatmul.mubr.msk.f32.gmra.mxu1 %vm377_vm3, %v1616_v61 }
  0xf1   : > { %v1686_v62 = vpop.f32.mrf.mxu0 }
  0xf2   : > { %v1689_v63 = vpop.f32.mrf.mxu1 }
  0xf3   : > { %v456_v0 = vpop.f32.mrf.mxu0 }
  0xf4   : > { %v466_v1 = vpop.f32.mrf.mxu1 }
  0xf5   : > { %v1702_v2 = vpop.f32.mrf.mxu0 }
  0xf6   : > { %v1694_v3 = vpop.f32.mrf.mxu1 }
  0xf7   : > { %v656_v4 = vpop.f32.mrf.mxu0  ;;  %v559_v10 = vadd.f32 %v1694_v3, %v1686_v62 }
  0xf8   : > { %v553_v5 = vpop.f32.mrf.mxu1 }
  0xf9   : > { %v1705_v6 = vpop.f32.mrf.mxu0  ;;  %v554_v13 = vadd.f32 %v553_v5, %v456_v0  ;;  %v676_v16 = vadd.f32 %v1702_v2, %v559_v10 }
  0xfa   : > { %v1697_v7 = vpop.f32.mrf.mxu1 }
  0xfb   : > { %v666_v8 = vpop.f32.mrf.mxu0  ;;  %v569_v17 = vadd.f32 %v1697_v7, %v1689_v63  ;;  %v675_v20 = vadd.f32 %v656_v4, %v554_v13 }
  0xfc   : > { %v563_v9 = vpop.f32.mrf.mxu1 }
  0xfd   : > { %v1718_v11 = vpop.f32.mrf.mxu0  ;;  %v564_v23 = vadd.f32 %v563_v9, %v466_v1  ;;  %v678_v25 = vadd.f32 %v1705_v6, %v569_v17 }
  0xfe   : > { %v1710_v12 = vpop.f32.mrf.mxu1 }
  0xff   : > { %v873_v14 = vpop.f32.mrf.mxu0  ;;  %v786_v21 = vadd.f32 %v1710_v12, %v676_v16  ;;  %v677_v32 = vadd.f32 %v666_v8, %v564_v23 }
 0x100   : > { %v766_v15 = vpop.f32.mrf.mxu1 }
 0x101   : > { %v1721_v18 = vpop.f32.mrf.mxu0  ;;  %v785_v26 = vadd.f32 %v766_v15, %v675_v20  ;;  %v893_v29 = vadd.f32 %v1718_v11, %v786_v21 }
 0x102   : > { %v1713_v19 = vpop.f32.mrf.mxu1 }
 0x103   : > { %v883_v22 = vpop.f32.mrf.mxu0  ;;  %v788_v30 = vadd.f32 %v1713_v19, %v678_v25  ;;  %v892_v34 = vadd.f32 %v873_v14, %v785_v26 }
 0x104   : > { %v776_v24 = vpop.f32.mrf.mxu1 }
 0x105   : > { %v1734_v27 = vpop.f32.mrf.mxu0  ;;  %v787_v37 = vadd.f32 %v776_v24, %v677_v32  ;;  %v895_v39 = vadd.f32 %v1721_v18, %v788_v30 }
 0x106   : > { %v1726_v28 = vpop.f32.mrf.mxu1 }
 0x107   : > { %v1090_v31 = vpop.f32.mrf.mxu0  ;;  %v1000_v35 = vadd.f32 %v1726_v28, %v893_v29  ;;  %v894_v46 = vadd.f32 %v883_v22, %v787_v37 }
 0x108   : > { %v980_v33 = vpop.f32.mrf.mxu1 }
 0x109   : > { %v1737_v36 = vpop.f32.mrf.mxu0  ;;  %v999_v40 = vadd.f32 %v980_v33, %v892_v34  ;;  %v1110_v43 = vadd.f32 %v1734_v27, %v1000_v35 }
 0x10a   : > { %v1729_v38 = vpop.f32.mrf.mxu1 }
 0x10b   : > { %v1100_v41 = vpop.f32.mrf.mxu0  ;;  %v1002_v44 = vadd.f32 %v1729_v38, %v895_v39  ;;  %v1109_v48 = vadd.f32 %v1090_v31, %v999_v40 }
 0x10c   : > { %v990_v42 = vpop.f32.mrf.mxu1 }
 0x10d   : > { %v1750_v45 = vpop.f32.mrf.mxu0  ;;  %v1001_v51 = vadd.f32 %v990_v42, %v894_v46  ;;  %v1112_v53 = vadd.f32 %v1737_v36, %v1002_v44 }
 0x10e   : > { %v1742_v47 = vpop.f32.mrf.mxu1 }
 0x10f   : > { %v1217_v49 = vadd.f32 %v1742_v47, %v1110_v43  ;;  %v1304_v50 = vpop.f32.mrf.mxu0  ;;  %v1111_v60 = vadd.f32 %v1100_v41, %v1001_v51 }
 0x110   : > { %v1197_v52 = vpop.f32.mrf.mxu1 }
 0x111   : > { %v1324_v54 = vadd.f32 %v1750_v45, %v1217_v49  ;;  %v1216_v55 = vadd.f32 %v1197_v52, %v1109_v48  ;;  %v1753_v59 = vpop.f32.mrf.mxu0 }
 0x112   : > { %v1745_v56 = vpop.f32.mrf.mxu1 }
 0x113   : > { %1328 = vst.msk [vmem:[%s1912_s13 + $0x8] sm:$0xff] %vm377_vm3, %v1324_v54  ;;  %v1323_v57 = vadd.f32 %v1304_v50, %v1216_v55  ;;  %v1219_v58 = vadd.f32 %v1745_v56, %v1112_v53  ;;  %v1347_v0 = vmul.f32 %v1324_v54, %v1324_v54  ;;  %v1314_v3 = vpop.f32.mrf.mxu0  ;;  %v1332_v4 = vsel %vm377_vm3, %v1324_v54, 0.0 }
 0x114   : > { %v1207_v61 = vpop.f32.mrf.mxu1 }
 0x115   : > { %1327 = vst.msk [vmem:[%s1912_s13] sm:$0xff] %vm377_vm3, %v1323_v57  ;;  %v1346_v62 = vmul.f32 %v1323_v57, %v1323_v57  ;;  %v1326_v63 = vadd.f32 %v1753_v59, %v1219_v58  ;;  %v1331_v1 = vsel %vm377_vm3, %v1323_v57, 0.0  ;;  %v1218_v2 = vadd.f32 %v1207_v61, %v1111_v60 }
 0x116   : > { %v1333_v7 = vadd.f32 %v1332_v4, %v1331_v1  ;;  %v1351_v8 = vsel %vm377_vm3, %v1347_v0, 0.0 }
 0x117   : > { %1330 = vst.msk [vmem:[%s1912_s13 + $0x18] sm:$0xff] %vm377_vm3, %v1326_v63  ;;  %v1350_v5 = vsel %vm377_vm3, %v1346_v62, 0.0  ;;  %v1325_v6 = vadd.f32 %v1314_v3, %v1218_v2  ;;  %v1349_v9 = vmul.f32 %v1326_v63, %v1326_v63  ;;  %v1336_v14 = vsel %vm377_vm3, %v1326_v63, 0.0 }
 0x118   : > { %v1352_v12 = vadd.f32 %v1351_v8, %v1350_v5 }
 0x119   : > { %1329 = vst.msk [vmem:[%s1912_s13 + $0x10] sm:$0xff] %vm377_vm3, %v1325_v6  ;;  %v1334_v10 = vsel %vm377_vm3, %v1325_v6, 0.0  ;;  %v1348_v11 = vmul.f32 %v1325_v6, %v1325_v6  ;;  %v1355_v18 = vsel %vm377_vm3, %v1349_v9, 0.0 }
 0x11a   : > { %v1335_v13 = vadd.f32 %v1334_v10, %v1333_v7 }
 0x11b   : > { %v1353_v15 = vsel %vm377_vm3, %v1348_v11, 0.0 }
 0x11c   : > { %v1337_v16 = vadd.f32 %v1336_v14, %v1335_v13  ;;  %v1354_v17 = vadd.f32 %v1353_v15, %v1352_v12 }
 0x11e   : > { %v1338_v19 = vrot.slane %v1337_v16, 4  ;;  %v1356_v20 = vadd.f32 %v1355_v18, %v1354_v17 }
 0x120   : > { %v1339_v21 = vadd.f32 %v1338_v19, %v1337_v16  ;;  %v1357_v22 = vrot.slane %v1356_v20, 4 }
 0x122   : > { %v1340_v23 = vrot.slane %v1339_v21, 2  ;;  %v1358_v24 = vadd.f32 %v1357_v22, %v1356_v20 }
 0x124   : > { %v1341_v25 = vadd.f32 %v1340_v23, %v1339_v21  ;;  %v1359_v26 = vrot.slane %v1358_v24, 2 }
 0x126   : > { %v1342_v27 = vrot.slane %v1341_v25, 1  ;;  %v1360_v28 = vadd.f32 %v1359_v26, %v1358_v24 }
 0x128   : > { %v1343_v29 = vadd.f32 %v1342_v27, %v1341_v25  ;;  %v1361_v30 = vrot.slane %v1360_v28, 1 }
 0x12a   : > { %1345 = vst.msk [vmem:[%s276_s16] sm:$0x1] %vm1344_vm4, %v1343_v29  ;;  %v1362_v31 = vadd.f32 %v1361_v30, %v1360_v28 }
 0x12c   : > { %1363 = vst.msk [vmem:[%s283_s28] sm:$0x1] %vm1344_vm4, %v1362_v31 }
 0x12d PF: > { %s16_s22 = sadd.s32 1, %s1835_s22   ;;  %s2104_s18 = smov %s1827_s20 }
 0x12e   : > { %p13_p8 = scmp.ge.s32.totalorder %s16_s22, 6   ;;  %s2105_s19 = smov %s1831_s21 }
 0x12f   : > { %s2106_s20 = smov %s2109_s23  ;;  %s2107_s21 = smov %s2113_s24 }
 0x130   :  { %15 = sbr.rel (!%p13_p8) target bundleno = 3 (0x3), region = 103 }

</bundles_post_ra>
